<compile_context>
chip_gen: v7x
topology: tpu7x:2x2x1
jax: 0.10.0
libtpu: 0.0.40
codegen_flags: <defaults>
</compile_context>

<pallas_src>
import jax
import jax.numpy as jnp
from jax.experimental import pallas as pl
from jax.experimental.pallas import tpu as pltpu

# Logical model dims (from the PyTorch module).  nv = v.shape[1] is data-
# dependent in the original; pick a small synthetic width and always round the
# padded bucket up to a multiple of 128 to avoid recompiles / partial K tiles.
NH, NH2, NH3, NOUT = 262, 130, 65, 5
NV = 64
BATCH = 256        # demo batch: 2 grid steps of TB=128
TB = 128           # batch tile (rows per grid step)


def _pad128(n: int) -> int:
    return ((n + 127) // 128) * 128


NV_P, NH_P, NH2_P, NH3_P, NOUT_P = map(_pad128, (NV, NH, NH2, NH3, NOUT))
NEG_INF = -1e30  # bias for padded softmax lanes -> exp underflows to exactly 0


def mlp_kernel(x_ref, w1_ref, b1_ref, w2_ref, b2_ref, w3_ref, b3_ref,
               w4_ref, b4_ref, o_ref):
    # Fused input cast (was a separate XLA dispatch in the wrapper).
    x = x_ref[...].astype(jnp.bfloat16)
    # Layers 1..3: Linear (bf16 MXU inputs, f32 accumulate) + sigmoid (f32 EUP;
    # kept f32 so the same kernel is correct on v5e which lacks bf16 VPU/EUP).
    h = jnp.dot(x, w1_ref[...], preferred_element_type=jnp.float32) + b1_ref[...]
    h = jax.nn.sigmoid(h)
    h = jnp.dot(h.astype(jnp.bfloat16), w2_ref[...],
                preferred_element_type=jnp.float32) + b2_ref[...]
    h = jax.nn.sigmoid(h)
    h = jnp.dot(h.astype(jnp.bfloat16), w3_ref[...],
                preferred_element_type=jnp.float32) + b3_ref[...]
    h = jax.nn.sigmoid(h)
    # Layer 4: Linear + softmax over the feature axis.  Padded output lanes
    # carry bias = -1e30, so exp(.) == 0 and they do not perturb the
    # denominator; they are sliced away by the consumer.
    logits = jnp.dot(h.astype(jnp.bfloat16), w4_ref[...],
                     preferred_element_type=jnp.float32) + b4_ref[...]
    m = jnp.max(logits, axis=-1, keepdims=True)
    e = jnp.exp(logits - m)
    denom = jnp.sum(e, axis=-1, keepdims=True)
    o_ref[...] = (e * pl.reciprocal(denom, approx=True)).astype(o_ref.dtype)


@jax.jit
def net_forward(x, params):
    """x: f32 [B, NV_P] (already zero-padded to a 128-multiple feature width).
    Returns f32 [B, NOUT_P]; real classes are columns [:NOUT]."""
    w1, b1, w2, b2, w3, b3, w4, b4 = params
    B = x.shape[0]
    b_pad = ((B + TB - 1) // TB) * TB
    if b_pad != B:                       # static branch; no-op when B % TB == 0
        x = jnp.pad(x, ((0, b_pad - B), (0, 0)))
    grid = (b_pad // TB,)
    const = lambda i: (0, 0)             # weights/biases: fetched once, VMEM-resident
    out = pl.pallas_call(
        mlp_kernel,
        grid=grid,
        in_specs=[
            pl.BlockSpec((TB, NV_P), lambda i: (i, 0)),      # x: one batch tile per step
            pl.BlockSpec((NV_P, NH_P), const),
            pl.BlockSpec((1, NH_P), const),
            pl.BlockSpec((NH_P, NH2_P), const),
            pl.BlockSpec((1, NH2_P), const),
            pl.BlockSpec((NH2_P, NH3_P), const),
            pl.BlockSpec((1, NH3_P), const),
            pl.BlockSpec((NH3_P, NOUT_P), const),
            pl.BlockSpec((1, NOUT_P), const),
        ],
        out_specs=pl.BlockSpec((TB, NOUT_P), lambda i: (i, 0)),
        out_shape=jax.ShapeDtypeStruct((b_pad, NOUT_P), jnp.float32),
        compiler_params=pltpu.CompilerParams(
            dimension_semantics=("parallel",)),              # v7x: split tiles across TCs
    )(x, w1, b1, w2, b2, w3, b3, w4, b4)
    return out[:B]


def init_params(key):
    """Deterministic init matching nn.Linear shapes, stored (in, out), zero-
    padded to lane multiples, weights cast to bf16 (biases stay f32 — required
    for the -1e30 padded-softmax-lane trick)."""
    ks = jax.random.split(key, 8)

    def linear(kw, kb, fan_in, fan_out, fan_in_p, fan_out_p, pad_bias=0.0):
        bound = 1.0 / jnp.sqrt(fan_in)
        w = jax.random.uniform(kw, (fan_in, fan_out), jnp.float32, -bound, bound)
        b = jax.random.uniform(kb, (fan_out,), jnp.float32, -bound, bound)
        w_p = jnp.zeros((fan_in_p, fan_out_p), jnp.float32).at[:fan_in, :fan_out].set(w)
        b_p = jnp.full((1, fan_out_p), pad_bias, jnp.float32).at[0, :fan_out].set(b)
        return w_p.astype(jnp.bfloat16), b_p

    w1, b1 = linear(ks[0], ks[1], NV, NH, NV_P, NH_P)
    w2, b2 = linear(ks[2], ks[3], NH, NH2, NH_P, NH2_P)
    w3, b3 = linear(ks[4], ks[5], NH2, NH3, NH2_P, NH3_P)
    w4, b4 = linear(ks[6], ks[7], NH3, NOUT, NH3_P, NOUT_P, pad_bias=NEG_INF)
    return (w1, b1, w2, b2, w3, b3, w4, b4)


def reference_forward(x, params):
    """Pure-JAX reference mirroring the kernel's bf16 rounding of matmul inputs."""
    w1, b1, w2, b2, w3, b3, w4, b4 = params
    f32 = lambda a: a.astype(jnp.float32)
    rebf = lambda a: a.astype(jnp.bfloat16).astype(jnp.float32)
    h = jax.nn.sigmoid(rebf(x) @ f32(w1) + b1)
    h = jax.nn.sigmoid(rebf(h) @ f32(w2) + b2)
    h = jax.nn.sigmoid(rebf(h) @ f32(w3) + b3)
    logits = rebf(h) @ f32(w4) + b4
    return jax.nn.softmax(logits, axis=1)[:, :NOUT]


if __name__ == "__main__":
    key = jax.random.PRNGKey(0)
    kx, kp = jax.random.split(key)
    # Synthetic input mimicking pixel data scaled to [0,1]; zero-pad the feature
    # axis once (outside the forward hot path) to the 128-lane bucket.
    x_raw = jax.random.uniform(kx, (BATCH, NV), jnp.float32)
    x = jnp.zeros((BATCH, NV_P), jnp.float32).at[:, :NV].set(x_raw)
    params = init_params(kp)

    out_padded = net_forward(x, params)
    out_padded = jax.block_until_ready(out_padded)
    out = out_padded[:, :NOUT]  # drop the zero-valued padded softmax lanes

    ref = reference_forward(x, params)
    assert out.shape == (BATCH, NOUT)
    assert jnp.allclose(out, ref, atol=5e-3, rtol=5e-3)
    assert jnp.allclose(jnp.sum(out, axis=1), jnp.ones((BATCH,)), atol=5e-3)
    print("KERNEL_OK")
</pallas_src>

<mosaic_0001>
module attributes {stable_mosaic.version = 11 : i64} {
  func.func @mlp_kernel(%arg0: i32, %arg1: memref<128x128xf32, #tpu.memory_space<vmem>>, %arg2: memref<128x384xbf16, #tpu.memory_space<vmem>>, %arg3: memref<1x384xf32, #tpu.memory_space<vmem>>, %arg4: memref<384x256xbf16, #tpu.memory_space<vmem>>, %arg5: memref<1x256xf32, #tpu.memory_space<vmem>>, %arg6: memref<256x128xbf16, #tpu.memory_space<vmem>>, %arg7: memref<1x128xf32, #tpu.memory_space<vmem>>, %arg8: memref<128x128xbf16, #tpu.memory_space<vmem>>, %arg9: memref<1x128xf32, #tpu.memory_space<vmem>>, %arg10: memref<128x128xf32, #tpu.memory_space<vmem>>) attributes {dimension_semantics = [#tpu.dimension_semantics<parallel>], iteration_bounds = array<i64: 2>, scalar_prefetch = 0 : i64, scratch_operands = 0 : i64, tpu.core_type = #tpu.core_type<tc>, window_params = [{transform_indices = @transform_0, window_bounds = array<i64: 128, 128>}, {pipeline_mode = #tpu.pipeline_mode<synchronous>, transform_indices = @transform_1, window_bounds = array<i64: 128, 384>}, {pipeline_mode = #tpu.pipeline_mode<synchronous>, transform_indices = @transform_2, window_bounds = array<i64: 1, 384>}, {pipeline_mode = #tpu.pipeline_mode<synchronous>, transform_indices = @transform_3, window_bounds = array<i64: 384, 256>}, {pipeline_mode = #tpu.pipeline_mode<synchronous>, transform_indices = @transform_4, window_bounds = array<i64: 1, 256>}, {pipeline_mode = #tpu.pipeline_mode<synchronous>, transform_indices = @transform_5, window_bounds = array<i64: 256, 128>}, {pipeline_mode = #tpu.pipeline_mode<synchronous>, transform_indices = @transform_6, window_bounds = array<i64: 1, 128>}, {pipeline_mode = #tpu.pipeline_mode<synchronous>, transform_indices = @transform_7, window_bounds = array<i64: 128, 128>}, {pipeline_mode = #tpu.pipeline_mode<synchronous>, transform_indices = @transform_8, window_bounds = array<i64: 1, 128>}, {transform_indices = @transform_9, window_bounds = array<i64: 128, 128>}]} {
    %c0 = arith.constant 0 : index
    %c0_0 = arith.constant 0 : index
    %0 = vector.load %arg1[%c0, %c0_0] : memref<128x128xf32, #tpu.memory_space<vmem>>, vector<128x128xf32>
    %1 = arith.truncf %0 : vector<128x128xf32> to vector<128x128xbf16>
    %c0_1 = arith.constant 0 : index
    %c0_2 = arith.constant 0 : index
    %2 = vector.load %arg2[%c0_1, %c0_2] : memref<128x384xbf16, #tpu.memory_space<vmem>>, vector<128x384xbf16>
    %cst = arith.constant dense<0.000000e+00> : vector<128x384xf32>
    %3 = tpu.matmul %1, %2, %cst {dimension_numbers = #tpu.dot_dimension_numbers<[1], [0], [0], [1], [0, 0, 1, 1], [], []>} : vector<128x128xbf16>, vector<128x384xbf16>, vector<128x384xf32> -> vector<128x384xf32>
    %c0_3 = arith.constant 0 : index
    %c0_4 = arith.constant 0 : index
    %4 = vector.load %arg3[%c0_3, %c0_4] : memref<1x384xf32, #tpu.memory_space<vmem>>, vector<1x384xf32>
    %5 = vector.broadcast %4 : vector<1x384xf32> to vector<128x384xf32>
    %6 = arith.addf %3, %5 : vector<128x384xf32>
    %7 = arith.negf %6 : vector<128x384xf32>
    %8 = math.exp %7 : vector<128x384xf32>
    %cst_5 = arith.constant 1.000000e+00 : f32
    %9 = vector.broadcast %cst_5 : f32 to vector<128x384xf32>
    %10 = arith.addf %9, %8 : vector<128x384xf32>
    %11 = arith.divf %9, %10 : vector<128x384xf32>
    %12 = arith.truncf %11 : vector<128x384xf32> to vector<128x384xbf16>
    %c0_6 = arith.constant 0 : index
    %c0_7 = arith.constant 0 : index
    %13 = vector.load %arg4[%c0_6, %c0_7] : memref<384x256xbf16, #tpu.memory_space<vmem>>, vector<384x256xbf16>
    %cst_8 = arith.constant dense<0.000000e+00> : vector<128x256xf32>
    %14 = tpu.matmul %12, %13, %cst_8 {dimension_numbers = #tpu.dot_dimension_numbers<[1], [0], [0], [1], [0, 0, 1, 1], [], []>} : vector<128x384xbf16>, vector<384x256xbf16>, vector<128x256xf32> -> vector<128x256xf32>
    %c0_9 = arith.constant 0 : index
    %c0_10 = arith.constant 0 : index
    %15 = vector.load %arg5[%c0_9, %c0_10] : memref<1x256xf32, #tpu.memory_space<vmem>>, vector<1x256xf32>
    %16 = vector.broadcast %15 : vector<1x256xf32> to vector<128x256xf32>
    %17 = arith.addf %14, %16 : vector<128x256xf32>
    %18 = arith.negf %17 : vector<128x256xf32>
    %19 = math.exp %18 : vector<128x256xf32>
    %cst_11 = arith.constant 1.000000e+00 : f32
    %20 = vector.broadcast %cst_11 : f32 to vector<128x256xf32>
    %21 = arith.addf %20, %19 : vector<128x256xf32>
    %22 = arith.divf %20, %21 : vector<128x256xf32>
    %23 = arith.truncf %22 : vector<128x256xf32> to vector<128x256xbf16>
    %c0_12 = arith.constant 0 : index
    %c0_13 = arith.constant 0 : index
    %24 = vector.load %arg6[%c0_12, %c0_13] : memref<256x128xbf16, #tpu.memory_space<vmem>>, vector<256x128xbf16>
    %cst_14 = arith.constant dense<0.000000e+00> : vector<128x128xf32>
    %25 = tpu.matmul %23, %24, %cst_14 {dimension_numbers = #tpu.dot_dimension_numbers<[1], [0], [0], [1], [0, 0, 1, 1], [], []>} : vector<128x256xbf16>, vector<256x128xbf16>, vector<128x128xf32> -> vector<128x128xf32>
    %c0_15 = arith.constant 0 : index
    %c0_16 = arith.constant 0 : index
    %26 = vector.load %arg7[%c0_15, %c0_16] : memref<1x128xf32, #tpu.memory_space<vmem>>, vector<1x128xf32>
    %27 = vector.broadcast %26 : vector<1x128xf32> to vector<128x128xf32>
    %28 = arith.addf %25, %27 : vector<128x128xf32>
    %29 = arith.negf %28 : vector<128x128xf32>
    %30 = math.exp %29 : vector<128x128xf32>
    %cst_17 = arith.constant 1.000000e+00 : f32
    %31 = vector.broadcast %cst_17 : f32 to vector<128x128xf32>
    %32 = arith.addf %31, %30 : vector<128x128xf32>
    %33 = arith.divf %31, %32 : vector<128x128xf32>
    %34 = arith.truncf %33 : vector<128x128xf32> to vector<128x128xbf16>
    %c0_18 = arith.constant 0 : index
    %c0_19 = arith.constant 0 : index
    %35 = vector.load %arg8[%c0_18, %c0_19] : memref<128x128xbf16, #tpu.memory_space<vmem>>, vector<128x128xbf16>
    %cst_20 = arith.constant dense<0.000000e+00> : vector<128x128xf32>
    %36 = tpu.matmul %34, %35, %cst_20 {dimension_numbers = #tpu.dot_dimension_numbers<[1], [0], [0], [1], [0, 0, 1, 1], [], []>} : vector<128x128xbf16>, vector<128x128xbf16>, vector<128x128xf32> -> vector<128x128xf32>
    %c0_21 = arith.constant 0 : index
    %c0_22 = arith.constant 0 : index
    %37 = vector.load %arg9[%c0_21, %c0_22] : memref<1x128xf32, #tpu.memory_space<vmem>>, vector<1x128xf32>
    %38 = vector.broadcast %37 : vector<1x128xf32> to vector<128x128xf32>
    %39 = arith.addf %36, %38 : vector<128x128xf32>
    %cst_23 = arith.constant dense<0xFF800000> : vector<128xf32>
    %40 = vector.multi_reduction <maximumf>, %39, %cst_23 [1] : vector<128x128xf32> to vector<128xf32>
    %41 = vector.shape_cast %40 : vector<128xf32> to vector<128x1xf32>
    %42 = vector.broadcast %41 : vector<128x1xf32> to vector<128x128xf32>
    %43 = arith.subf %39, %42 : vector<128x128xf32>
    %44 = math.exp %43 : vector<128x128xf32>
    %cst_24 = arith.constant dense<0.000000e+00> : vector<128xf32>
    %45 = vector.multi_reduction <add>, %44, %cst_24 [1] : vector<128x128xf32> to vector<128xf32>
    %46 = vector.shape_cast %45 : vector<128xf32> to vector<128x1xf32>
    %47 = tpu.reciprocal %46 {approx = true} : vector<128x1xf32> -> vector<128x1xf32>
    %48 = vector.broadcast %47 : vector<128x1xf32> to vector<128x128xf32>
    %49 = arith.mulf %44, %48 : vector<128x128xf32>
    %c0_25 = arith.constant 0 : index
    %c0_26 = arith.constant 0 : index
    %50 = vector.load %arg10[%c0_25, %c0_26] : memref<128x128xf32, #tpu.memory_space<vmem>>, vector<128x128xf32>
    tpu.vector_store %arg10[%c0_25, %c0_26], %49 {strides = array<i32>} : memref<128x128xf32, #tpu.memory_space<vmem>>, vector<128x128xf32>,
    return
  }
  func.func @transform_0(%arg0: i32) -> (i32, i32) {
    %c0_i32 = arith.constant 0 : i32
    %c0_i32_0 = arith.constant 0 : i32
    return %arg0, %c0_i32 : i32, i32
  }
  func.func @transform_1(%arg0: i32) -> (i32, i32) {
    %c0_i32 = arith.constant 0 : i32
    %c0_i32_0 = arith.constant 0 : i32
    %c0_i32_1 = arith.constant 0 : i32
    return %c0_i32, %c0_i32_0 : i32, i32
  }
  func.func @transform_2(%arg0: i32) -> (i32, i32) {
    %c0_i32 = arith.constant 0 : i32
    %c0_i32_0 = arith.constant 0 : i32
    %c0_i32_1 = arith.constant 0 : i32
    return %c0_i32, %c0_i32_0 : i32, i32
  }
  func.func @transform_3(%arg0: i32) -> (i32, i32) {
    %c0_i32 = arith.constant 0 : i32
    %c0_i32_0 = arith.constant 0 : i32
    %c0_i32_1 = arith.constant 0 : i32
    return %c0_i32, %c0_i32_0 : i32, i32
  }
  func.func @transform_4(%arg0: i32) -> (i32, i32) {
    %c0_i32 = arith.constant 0 : i32
    %c0_i32_0 = arith.constant 0 : i32
    %c0_i32_1 = arith.constant 0 : i32
    return %c0_i32, %c0_i32_0 : i32, i32
  }
  func.func @transform_5(%arg0: i32) -> (i32, i32) {
    %c0_i32 = arith.constant 0 : i32
    %c0_i32_0 = arith.constant 0 : i32
    %c0_i32_1 = arith.constant 0 : i32
    return %c0_i32, %c0_i32_0 : i32, i32
  }
  func.func @transform_6(%arg0: i32) -> (i32, i32) {
    %c0_i32 = arith.constant 0 : i32
    %c0_i32_0 = arith.constant 0 : i32
    %c0_i32_1 = arith.constant 0 : i32
    return %c0_i32, %c0_i32_0 : i32, i32
  }
  func.func @transform_7(%arg0: i32) -> (i32, i32) {
    %c0_i32 = arith.constant 0 : i32
    %c0_i32_0 = arith.constant 0 : i32
    %c0_i32_1 = arith.constant 0 : i32
    return %c0_i32, %c0_i32_0 : i32, i32
  }
  func.func @transform_8(%arg0: i32) -> (i32, i32) {
    %c0_i32 = arith.constant 0 : i32
    %c0_i32_0 = arith.constant 0 : i32
    %c0_i32_1 = arith.constant 0 : i32
    return %c0_i32, %c0_i32_0 : i32, i32
  }
  func.func @transform_9(%arg0: i32) -> (i32, i32) {
    %c0_i32 = arith.constant 0 : i32
    %c0_i32_0 = arith.constant 0 : i32
    return %arg0, %c0_i32 : i32, i32
  }
}

</mosaic_0001>

<bundles_post_ra>
// kernel: net_forward.1
= control target key start
LH: loop header
LB: loop body
LE: loop exit
PB: predicated region body
PF: predicated region fallthrough
CT: control target
= control target key end

     0   :  { %s4903_s0 = inlined_call_operand.hbm [shape: f32[256,128], index: 0, kind: input, shape index: {}]   ;;  %s4904_s1 = inlined_call_operand.hbm [shape: bf16[128,384], index: 1, kind: input, shape index: {}]   ;;  %s4905_s2 = inlined_call_operand.vmem [shape: f32[1,384], index: 2, kind: input, shape index: {}]   ;;  %s4906_s3 = inlined_call_operand.hbm [shape: bf16[384,256], index: 3, kind: input, shape index: {}]   ;;  %s4907_s4 = inlined_call_operand.vmem [shape: f32[1,256], index: 4, kind: input, shape index: {}]   ;;  %s4908_s5 = inlined_call_operand.hbm [shape: bf16[256,128], index: 5, kind: input, shape index: {}]   ;;  %s4909_s6 = inlined_call_operand.vmem [shape: f32[1,128], index: 6, kind: input, shape index: {}]   ;;  %s4910_s7 = inlined_call_operand.hbm [shape: bf16[128,128], index: 7, kind: input, shape index: {}]   ;;  %s4911_s8 = inlined_call_operand.vmem [shape: f32[1,128], index: 8, kind: input, shape index: {}]   ;;  %s4912_s9 = inlined_call_operand.hbm [shape: f32[256,128], index: 9, kind: output, shape index: {}]  }
   0x1   :  { %4920 = sst [smem:[#allocation18_spill]] %s4904_s1 }
   0x2   :  { %14 = vsyncpa [#allocation3], 0 }
   0x3   :  { %16 = vsyncpa [#allocation3 + $0x1], 0 }
   0x4   :  { %17 = vsyncpa [#allocation6], 0 }
   0x5   :  { %18 = vsyncpa [#allocation9], 0 }
   0x6   :  { %19 = vsyncpa [#allocation4], 0 }
   0x7   :  { %21 = vsyncpa [#allocation4 + $0x1], 0  ;;  %s4071_s30 = smov 0   ;;  %s4073_s10 = smov 0  }
   0x8   :  { %s4075_s11 = smov 0   ;;  %s4077_s12 = smov 0  }
   0x9 LB: > { %4921 = sst [smem:[#allocation16_spill]] %s3992_s30  ;;  %s4092_s13 = sadd.s32 4294967295, %s4004_s12   ;;  %s4004_s12 = sphi %s4077_s12, %s4947_s12   ;;  %s4000_s11 = sphi %s4075_s11, %s4946_s11   ;;  %s3996_s10 = sphi %s4073_s10, %s4945_s10   ;;  %s3992_s30 = sphi %s4071_s30, %s4944_s30  }
   0xa   : > { %s2658_s14 = sadd.s32 4294967294, %s4004_s12   ;;  %p47_p0 = scmp.ne.s32.totalorder %s3996_s10, %s3992_s30 }
   0xb   : > { %p4913_p1 = scmp.eq.s32.totalorder %s4092_s13, 0  ;;  %p245_p3 = scmp.eq.s32.totalorder %s2658_s14, 1 }
   0xc   : > { %p2659_p5 = scmp.ge.s32.totalorder %s4004_s12, 1  ;;  %p252_p7 = scmp.lt.s32.totalorder %s4004_s12, 3 }
   0xd   : > { %p4101_p4 = por %p4913_p1, %p47_p0  ;;  %p4106_p6 = por %p245_p3, %p47_p0 }
   0xe   : > { %p4111_p8 = pnand %p2659_p5, %p252_p7  ;;  %s4006_s18 = smov [#allocation5]  }
   0xf   : > { %s4922_s15 = scalar_select %p4101_p4, 1, 0 }
  0x10   : > { %s4923_s16 = scalar_select %p4106_p6, 1, 0 }
  0x11   : > { %s4925_s17 = scalar_select %p4111_p8, 1, 0 }
  0x12   : > { %4924 = sst [smem:[#allocation17_spill]] %s4923_s16  ;;  %s264_s19 = sshll.u32 %s4006_s18, 4  ;;  %s4115_s19 = int_to_ptr.vmem [resolvable:$true] %s264_s19 }
  0x13   : > { %p3136_p9 = pneg %p4111_p8  ;;  %s4007_s21 = smov [#allocation8]  }
  0x14   : > { %s296_s22 = sshll.u32 %s4007_s21, 4  ;;  %s4927_s1 = sld [smem:[#allocation18_spill]]  ;;  %s4126_s22 = int_to_ptr.vmem [resolvable:$true] %s296_s22 }
  0x15   : > { %p4122_p11 = pnand %p3136_p9, %p4913_p1 }
  0x17   : > { %p4136_p13 = pneg %p4122_p11 }
  0x1a   : > { %s3788_s25 = scalar_lea.hbm %s4927_s1, 3072 }
  0x1b   : > { %p3789_p12 = scmp.ne.s32.totalorder %s4927_s1, %s3788_s25  ;;  %p3795_p5 = scmp.lt.u32.totalorder %s3788_s25, %s4927_s1 }
  0x1d   : > { %p3791_p0 = pnand %p4136_p13, %p3789_p12 }
  0x1f   : > { %p3792_p3 = pneg %p3791_p0 }
  0x21   : > { %p3797_p7 = pnand %p3795_p5, %p3792_p3 }
  0x23   : > { %3800 = shalt.err (!%p3797_p7)
}
  0x24   : > { %s3801_s18 = scalar_lea.vmem %s4115_s19, 3072  ;;  %p3809_p2 = scmp.lt.s32.totalorder %s4115_s19, %s4115_s19 }
  0x25   : > { %p3802_p9 = scmp.ne.s32.totalorder %s4115_s19, %s3801_s18  ;;  %p3810_p6 = scmp.lt.s32.totalorder %s3801_s18, %s3801_s18 }
  0x27   : > { %p3804_p10 = pnand %p3802_p9, %p4136_p13  ;;  %p3811_p12 = por %p3810_p6, %p3809_p2 }
  0x29   : > { %p3805_p1 = pneg %p3804_p10 }
  0x2b   : > { %p3812_p0 = pnand %p3811_p12, %p3805_p1 }
  0x2d   : > { %3815 = shalt.err (!%p3812_p0)
}
  0x2e   : > { %s4008_s21 = smov 192   ;;  %s4009_s23 = smov 12  }
  0x2f   : > { %3139 = dma.hbm_to_vmem [thread:$0]  (!%p4122_p11), %s4927_s1, 3072, %s4115_s19, [#allocation6], %s4008_s21, %s4008_s21, %s4009_s23  }
  0x30   : > { %s3816_s29 = scalar_lea.hbm %s4908_s5, 2048 }
  0x31   : > { %p3817_p2 = scmp.ne.s32.totalorder %s4908_s5, %s3816_s29  ;;  %p3823_p10 = scmp.lt.u32.totalorder %s3816_s29, %s4908_s5 }
  0x33   : > { %p3819_p1 = pnand %p3817_p2, %p4136_p13 }
  0x35   : > { %p3820_p6 = pneg %p3819_p1 }
  0x37   : > { %p3825_p3 = pnand %p3823_p10, %p3820_p6 }
  0x39   : > { %3828 = shalt.err (!%p3825_p3)
}
  0x3a   : > { %s3829_s19 = scalar_lea.vmem %s4126_s22, 2048  ;;  %p3837_p12 = scmp.lt.s32.totalorder %s4126_s22, %s4126_s22 }
  0x3b   : > { %p3830_p5 = scmp.ne.s32.totalorder %s4126_s22, %s3829_s19  ;;  %p3838_p0 = scmp.lt.s32.totalorder %s3829_s19, %s3829_s19 }
  0x3d   : > { %p3832_p7 = pnand %p3830_p5, %p4136_p13  ;;  %p3839_p2 = por %p3838_p0, %p3837_p12 }
  0x3f   : > { %p3833_p9 = pneg %p3832_p7 }
  0x41   : > { %p3840_p1 = pnand %p3839_p2, %p3833_p9 }
  0x43   : > { %3843 = shalt.err (!%p3840_p1)
}
  0x44   : > { %s4918_s16 = smov 64   ;;  %s4919_s30 = smov 4  }
  0x45   : > { %3145 = dma.hbm_to_vmem [thread:$0]  (!%p4122_p11), %s4908_s5, 2048, %s4126_s22, [#allocation9], %s4918_s16, %s4918_s16, %s4919_s30  }
  0x46   : > { %s4012_s24 = smov [#allocation7]   ;;  %s3844_s29 = scalar_lea.hbm %s4906_s3, 6144 }
  0x47   : > { %s280_s25 = sshll.u32 %s4012_s24, 4  ;;  %p3845_p6 = scmp.ne.s32.totalorder %s4906_s3, %s3844_s29  ;;  %s281_s25 = int_to_ptr.vmem [resolvable:$true] %s280_s25 }
  0x48   : > { %p3851_p5 = scmp.lt.u32.totalorder %s3844_s29, %s4906_s3 }
  0x49   : > { %p3847_p10 = pnand %p3845_p6, %p4136_p13 }
  0x4b   : > { %p3848_p3 = pneg %p3847_p10 }
  0x4d   : > { %p3853_p7 = pnand %p3851_p5, %p3848_p3 }
  0x4f   : > { %3856 = shalt.err (!%p3853_p7)
}
  0x50   : > { %s3857_s22 = scalar_lea.vmem %s281_s25, 6144  ;;  %p3865_p2 = scmp.lt.s32.totalorder %s281_s25, %s281_s25 }
  0x51   : > { %p3858_p9 = scmp.ne.s32.totalorder %s281_s25, %s3857_s22  ;;  %p3866_p1 = scmp.lt.s32.totalorder %s3857_s22, %s3857_s22 }
  0x53   : > { %p3860_p12 = pnand %p3858_p9, %p4136_p13  ;;  %p3867_p4 = por %p3866_p1, %p3865_p2 }
  0x55   : > { %p3861_p0 = pneg %p3860_p12 }
  0x57   : > { %p3868_p8 = pnand %p3867_p4, %p3861_p0 }
  0x59   : > { %3871 = shalt.err (!%p3868_p8)
}
  0x5a   : > { %s4013_s21 = smov 128   ;;  %s4014_s23 = smov 8  }
  0x5b   : > { %3142 = dma.hbm_to_vmem [thread:$0]  (!%p4122_p11), %s4906_s3, 6144, %s281_s25, [#allocation6], %s4013_s21, %s4013_s21, %s4014_s23  }
  0x5c   : > { %s4015_s26 = smov [#allocation10]   ;;  %s3872_s18 = scalar_lea.hbm %s4910_s7, 1024 }
  0x5d   : > { %s312_s27 = sshll.u32 %s4015_s26, 4  ;;  %p3873_p4 = scmp.ne.s32.totalorder %s4910_s7, %s3872_s18  ;;  %s313_s27 = int_to_ptr.vmem [resolvable:$true] %s312_s27 }
  0x5e   : > { %p3879_p10 = scmp.lt.u32.totalorder %s3872_s18, %s4910_s7 }
  0x5f   : > { %p3875_p8 = pnand %p3873_p4, %p4136_p13 }
  0x61   : > { %p3876_p6 = pneg %p3875_p8 }
  0x63   : > { %p3881_p3 = pnand %p3879_p10, %p3876_p6 }
  0x65   : > { %3884 = shalt.err (!%p3881_p3)
}
  0x66   : > { %s3885_s25 = scalar_lea.vmem %s313_s27, 1024  ;;  %p3893_p12 = scmp.lt.s32.totalorder %s313_s27, %s313_s27 }
  0x67   : > { %p3886_p5 = scmp.ne.s32.totalorder %s313_s27, %s3885_s25  ;;  %p3894_p0 = scmp.lt.s32.totalorder %s3885_s25, %s3885_s25 }
  0x69   : > { %p3888_p7 = pnand %p3886_p5, %p4136_p13  ;;  %p3895_p2 = por %p3894_p0, %p3893_p12 }
  0x6b   : > { %p3889_p9 = pneg %p3888_p7 }
  0x6d   : > { %p3896_p1 = pnand %p3895_p2, %p3889_p9 }
  0x6f   : > { %3899 = shalt.err (!%p3896_p1)
}
  0x70   : > { %s4929_s1 = smov 4   ;;  %s4930_s24 = smov 64  }
  0x71   : > { %3148 = dma.hbm_to_vmem [thread:$0]  (!%p4122_p11), %s4910_s7, 1024, %s313_s27, [#allocation9], %s4930_s24, %s4930_s24, %s4929_s1  }
  0x72   : > { %s4226_s28 = sadd.s32 1, %s4004_s12   ;;  %s34_s20 = sadd.s32 1, %s4000_s11 }
  0x73   : > { %s31_s26 = ssub.s32 %s4004_s12, %s4226_s28  ;;  %p41_p13 = scmp.ne.s32.totalorder %s4000_s11, %s3996_s10 }
  0x74   : > { %p32_p4 = scmp.eq.s32.totalorder %s31_s26, 0  ;;  %p42_p8 = scmp.eq.s32.totalorder %s4004_s12, 0 }
  0x75   : > { %p4931_p6 = scmp.eq.s32.totalorder %s4092_s13, 1  ;;  %p3161_p3 = scmp.lt.s32.totalorder %s4004_s12, 2 }
  0x76   : > { %s4242_s14 = scalar_select %p32_p4, %s4000_s11, %s34_s20  }
  0x77   : > { %p4236_p10 = por %p4931_p6, %p41_p13  ;;  %p43_p5 = por %p42_p8, %p41_p13 }
  0x78   : > { %s329_s18 = sand.u32 1, %s4000_s11   ;;  %s2874_s27 = sshll.u32 %s4004_s12, 11 }
  0x79   : > { %s2665_s19 = sshll.u32 %s329_s18, 7  ;;  %s4249_s1 = scalar_lea.hbm %s4903_s0, %s2874_s27 }
  0x7a   : > { %s333_s24 = scalar_lea.vmem [#allocation2], %s2665_s19  ;;  %p4253_p11 = pnand %p3161_p3, %p43_p5 }
  0x7b   : > { %s340_s16 = sshll.u32 %s333_s24, 4  ;;  %s4257_s20 = scalar_lea.sflag [#allocation3], %s329_s18  ;;  %s4251_s16 = int_to_ptr.vmem [resolvable:$true] %s340_s16 }
  0x7c   : > { %s3900_s26 = scalar_lea.hbm %s4249_s1, 2048  ;;  %p3902_p9 = pneg %p4253_p11 }
  0x7d   : > { %p3901_p7 = scmp.ne.s32.totalorder %s4249_s1, %s3900_s26  ;;  %s3905_s22 = scalar_lea.hbm %s4903_s0, 4096 }
  0x7e   : > { %p3906_p2 = scmp.lt.u32.totalorder %s4249_s1, %s4903_s0  ;;  %p3907_p1 = scmp.lt.u32.totalorder %s3905_s22, %s3900_s26 }
  0x7f   : > { %p3903_p12 = pnand %p3902_p9, %p3901_p7  ;;  %p3909_p4 = scmp.lt.u32.totalorder %s3900_s26, %s4249_s1 }
  0x80   : > { %p3908_p13 = por %p3907_p1, %p3906_p2 }
  0x81   : > { %p3904_p0 = pneg %p3903_p12 }
  0x82   : > { %p3910_p8 = por %p3909_p4, %p3908_p13 }
  0x84   : > { %p3911_p6 = pnand %p3910_p8, %p3904_p0 }
  0x86   : > { %3914 = shalt.err (!%p3911_p6)
}
  0x87   : > { %s3915_s18 = scalar_lea.vmem %s4251_s16, 2048  ;;  %s4016_s19 = smov [#allocation2]  }
  0x88   : > { %p3916_p3 = scmp.ne.s32.totalorder %s4251_s16, %s3915_s18  ;;  %s3920_s27 = sshll.u32 %s4016_s19, 4  ;;  %s3921_s27 = int_to_ptr.vmem [resolvable:$false] %s3920_s27 }
  0x89   : > { %s3922_s25 = scalar_lea.vmem %s3921_s27, 4096  ;;  %p3923_p12 = scmp.lt.s32.totalorder %s4251_s16, %s3921_s27 }
  0x8a   : > { %p3918_p5 = pnand %p3916_p3, %p3902_p9  ;;  %p3924_p2 = scmp.lt.s32.totalorder %s3922_s25, %s3915_s18 }
  0x8c   : > { %p3919_p7 = pneg %p3918_p5  ;;  %p3925_p1 = por %p3924_p2, %p3923_p12 }
  0x8e   : > { %p3926_p13 = pnand %p3925_p1, %p3919_p7 }
  0x90   : > { %3929 = shalt.err (!%p3926_p13)
}
  0x91   : > { %3152 = dma.hbm_to_vmem [thread:$0]  (!%p4253_p11), %s4249_s1, 2048, %s4251_s16, %s4257_s20, %s4013_s21, %s4013_s21, %s4014_s23  }
  0x92   : > { %p4934_p9 = scmp.ne.s32.totalorder %s4925_s17, 0 }
  0x93   : > { %s4291_s26 = sand.u32 (!%p4934_p9), 1, %s3996_s10   ;;  %p4935_p0 = scmp.ne.s32.totalorder (!%p4934_p9), %s4922_s15, 0 }
  0x94   : > { %352 = sbr.rel (%p4934_p9) target bundleno = 1645 (0x66d), region = 56  ;;  %s2669_s22 = sshll.u32 (!%p4934_p9), %s4291_s26, 7 }
  0x95   : > { %s355_s24 = scalar_lea.sflag (!%p4934_p9), [#allocation3], %s4291_s26  ;;  %s4297_s30 = scalar_lea.vmem (!%p4934_p9), [#allocation2], %s2669_s22 }
  0x9b   : > { %3975 = dma.done.wait (%p4935_p0), %s355_s24, 2048  }
  0x9c   : > { %3977 = vsyncadd (%p4935_p0), %s355_s24, 4294965248  ;;  %p4936_p11 = scmp.eq.s32.totalorder %s4092_s13, 0 }
  0x9e   : > { %3979 = dma.done.wait (%p4936_p11), [#allocation6], 9216   ;;  %p4937_p4 = pmov %p4936_p11 }
  0xa0   : > { %3981 = vsyncadd (%p4937_p4), [#allocation6], 4294958080  ;;  %p4938_p8 = pmov %p4937_p4 }
  0xa1   : > { %p4939_p6 = pmov %p4937_p4 }
  0xa2   : > { %3983 = dma.done.wait (%p4938_p8), [#allocation9], 3072  }
  0xa3   : > { %3985 = vsyncadd (%p4939_p6), [#allocation9], 4294964224  ;;  %v4017_v0 = vmov 0   ;;  %v3212_v1 = vld [vmem:[#allocation5 + $0x4] ss:$12 sps:$4 sm:$0xff]   ;;  %v413_v16 = vld [vmem:[%s4297_s30 + $0x8] sm:$0xff] }
  0xa4   : > { %645 = vmatprep.mubr.bf16.mxu0 %v4017_v0  ;;  %v3214_v2 = vld [vmem:[#allocation5] ss:$12 sps:$4 sm:$0xff]   ;;  %613 = vmatprep.subr.bf16.mxu0 %v3212_v1  ;;  %v3215_v3 = vld [vmem:[#allocation5 + $0x1c] ss:$12 sps:$4 sm:$0xff]   ;;  %v3217_v4 = vld [vmem:[#allocation5 + $0x18] ss:$12 sps:$4 sm:$0xff]  }
  0xa5   : > { %614 = vmatpush1.bf16.msra.mxu0 %v3214_v2  ;;  %v3218_v5 = vld [vmem:[#allocation5 + $0x34] ss:$12 sps:$4 sm:$0xff]   ;;  %v3220_v6 = vld [vmem:[#allocation5 + $0x30] ss:$12 sps:$4 sm:$0xff]   ;;  %v3221_v8 = vld [vmem:[#allocation5 + $0x4c] ss:$12 sps:$4 sm:$0xff]  }
  0xa6   : > { %615 = vmatprep.subr.bf16.mxu0 %v3215_v3  ;;  %v3227_v7 = vld [vmem:[#allocation5 + $0x8] ss:$12 sps:$4 sm:$0xff]   ;;  %v3231_v9 = vld [vmem:[#allocation5 + $0x20] ss:$12 sps:$4 sm:$0xff]   ;;  %v3224_v11 = vld [vmem:[#allocation5 + $0x64] ss:$12 sps:$4 sm:$0xff]  }
  0xa7   : > { %2972 = vmatprep.subr.bf16.mxu1 %v3227_v7  ;;  %v3223_v10 = vld [vmem:[#allocation5 + $0x48] ss:$12 sps:$4 sm:$0xff]   ;;  %v3235_v12 = vld [vmem:[#allocation5 + $0x38] ss:$12 sps:$4 sm:$0xff]   ;;  %v3226_v13 = vld [vmem:[#allocation5 + $0x60] ss:$12 sps:$4 sm:$0xff]  }
  0xa8   : > { %2973 = vmatpush3.bf16.msra.mxu1 %v3227_v7  ;;  %v3239_v14 = vld [vmem:[#allocation5 + $0x50] ss:$12 sps:$4 sm:$0xff]   ;;  %v412_v15 = vld [vmem:[%s4297_s30] sm:$0xff]  ;;  %v3240_v20 = vld [vmem:[#allocation5 + $0x68] ss:$12 sps:$4 sm:$0xff]   ;;  %s4819_s19 = scalar_lea.vmem [#allocation11], %s2669_s22 }
  0xa9   : > { %616 = vmatpush1.bf16.msra.mxu0 %v3217_v4  ;;  %2974 = vmatprep.subr.bf16.mxu1 %v3231_v9  ;;  %v3228_v17 = vld [vmem:[#allocation5 + $0x7c] ss:$12 sps:$4 sm:$0xff]   ;;  %v428_v18 = vpack.c.bf16 %v413_v16, %v412_v15  ;;  %v3230_v19 = vld [vmem:[#allocation5 + $0x78] ss:$12 sps:$4 sm:$0xff]   ;;  %v3232_v21 = vld [vmem:[#allocation5 + $0x94] ss:$12 sps:$4 sm:$0xff]  }
  0xaa   : > { %617 = vmatprep.subr.bf16.mxu0 %v3218_v5  ;;  %v3234_v22 = vld [vmem:[#allocation5 + $0x90] ss:$12 sps:$4 sm:$0xff]   ;;  %v3241_v23 = vld [vmem:[#allocation5 + $0x80] ss:$12 sps:$4 sm:$0xff]   ;;  %v3238_v25 = vld [vmem:[#allocation5 + $0xa8] ss:$12 sps:$4 sm:$0xff]  }
  0xab   : > { %2988 = vmatprep.mubr.bf16.mxu1 %v428_v18  ;;  %v3236_v24 = vld [vmem:[#allocation5 + $0xac] ss:$12 sps:$4 sm:$0xff]   ;;  %v3243_v28 = vld [vmem:[#allocation5 + $0xb0] ss:$12 sps:$4 sm:$0xff]   ;;  %v3244_v29 = vld [vmem:[#allocation7] ss:$8 sps:$4 sm:$0xff]  }
  0xac   : > { %2975 = vmatpush3.bf16.msra.mxu1 %v3231_v9  ;;  %v3242_v26 = vld [vmem:[#allocation5 + $0x98] ss:$12 sps:$4 sm:$0xff]   ;;  %v3249_v30 = vld [vmem:[#allocation7 + $0x14] ss:$8 sps:$4 sm:$0xff]   ;;  %v417_v35 = vld [vmem:[%s4297_s30 + $0x28] sm:$0xff]  ;;  %s2875_s27 = sshll.u32 %s4092_s13, 11 }
  0xad   : > { %618 = vmatpush1.bf16.msra.mxu0 %v3220_v6  ;;  %2976 = vmatprep.subr.bf16.mxu1 %v3235_v12  ;;  %v3246_v27 = vld [vmem:[#allocation7 + $0x4] ss:$8 sps:$4 sm:$0xff]   ;;  %v414_v31 = vld [vmem:[%s4297_s30 + $0x10] sm:$0xff]  ;;  %v415_v32 = vld [vmem:[%s4297_s30 + $0x18] sm:$0xff]  ;;  %s2547_s25 = sshll.u32 %s4819_s19, 4  ;;  %s2534_s13 = scalar_lea.sflag [#allocation4], %s4291_s26  ;;  %s4856_s25 = int_to_ptr.vmem [resolvable:$true] %s2547_s25 }
  0xae   : > { %619 = vmatprep.subr.bf16.mxu0 %v3221_v8  ;;  %v3247_v33 = vld [vmem:[#allocation7 + $0x10] ss:$8 sps:$4 sm:$0xff]   ;;  %v416_v34 = vld [vmem:[%s4297_s30 + $0x20] sm:$0xff]  ;;  %v429_v37 = vpack.c.bf16 %v415_v32, %v414_v31  ;;  %v3255_v39 = vld [vmem:[#allocation7 + $0x34] ss:$8 sps:$4 sm:$0xff]   ;;  %s3930_s15 = scalar_lea.vmem %s4856_s25, 2048 }
  0xaf   : > { %v3252_v36 = vld [vmem:[#allocation7 + $0x24] ss:$8 sps:$4 sm:$0xff]   ;;  %v3250_v38 = vld [vmem:[#allocation7 + $0x20] ss:$8 sps:$4 sm:$0xff]   ;;  %v430_v40 = vpack.c.bf16 %v417_v35, %v416_v34  ;;  %v418_v41 = vld [vmem:[%s4297_s30 + $0x30] sm:$0xff]  ;;  %v470_v34 = vlaneseq  ;;  %p3931_p3 = scmp.ne.s32.totalorder %s4856_s25, %s3930_s15  ;;  %s4018_s17 = smov [#allocation11]  }
  0xb0   : > { %2977 = vmatpush3.bf16.msra.mxu1 %v3235_v12  ;;  %v419_v42 = vld [vmem:[%s4297_s30 + $0x38] sm:$0xff]  ;;  %v420_v44 = vld [vmem:[%s4297_s30 + $0x40] sm:$0xff]  ;;  %v421_v45 = vld [vmem:[%s4297_s30 + $0x48] sm:$0xff]  ;;  %s3934_s21 = sshll.u32 %s4018_s17, 4  ;;  %s3935_s21 = int_to_ptr.vmem [resolvable:$false] %s3934_s21 }
  0xb1   : > { %620 = vmatpush1.bf16.msra.mxu0 %v3223_v10  ;;  %2978 = vmatprep.subr.bf16.mxu1 %v3239_v14  ;;  %v3253_v43 = vld [vmem:[#allocation7 + $0x30] ss:$8 sps:$4 sm:$0xff]   ;;  %v3258_v46 = vld [vmem:[#allocation7 + $0x44] ss:$8 sps:$4 sm:$0xff]   ;;  %v3256_v47 = vld [vmem:[#allocation7 + $0x40] ss:$8 sps:$4 sm:$0xff]   ;;  %v431_v48 = vpack.c.bf16 %v419_v42, %v418_v41  ;;  %v432_v50 = vpack.c.bf16 %v421_v45, %v420_v44  ;;  %p3932_p5 = pnand %p3931_p3, %p4236_p10  ;;  %p3937_p12 = scmp.lt.s32.totalorder %s4856_s25, %s3935_s21 }
  0xb2   : > { %621 = vmatprep.subr.bf16.mxu0 %v3224_v11  ;;  %v3261_v49 = vld [vmem:[#allocation7 + $0x54] ss:$8 sps:$4 sm:$0xff]   ;;  %v3259_v53 = vld [vmem:[#allocation7 + $0x50] ss:$8 sps:$4 sm:$0xff]   ;;  %v424_v54 = vld [vmem:[%s4297_s30 + $0x60] sm:$0xff]  ;;  %v4381_v35 = vshrl.u32 %v470_v34, 7 }
  0xb3   : > { %v422_v51 = vld [vmem:[%s4297_s30 + $0x50] sm:$0xff]  ;;  %v423_v52 = vld [vmem:[%s4297_s30 + $0x58] sm:$0xff]  ;;  %v425_v55 = vld [vmem:[%s4297_s30 + $0x68] sm:$0xff]  ;;  %p3933_p7 = pneg %p3932_p5  ;;  %s3936_s23 = scalar_lea.vmem %s3935_s21, 4096 }
  0xb4   : > { %2979 = vmatpush3.bf16.msra.mxu1 %v3239_v14  ;;  %v3264_v56 = vld [vmem:[#allocation7 + $0x64] ss:$8 sps:$4 sm:$0xff]   ;;  %v433_v57 = vpack.c.bf16 %v423_v52, %v422_v51  ;;  %v3262_v58 = vld [vmem:[#allocation7 + $0x60] ss:$8 sps:$4 sm:$0xff]   ;;  %v3267_v59 = vld [vmem:[#allocation7 + $0x74] ss:$8 sps:$4 sm:$0xff]   ;;  %v434_v60 = vpack.c.bf16 %v425_v55, %v424_v54  ;;  %p3938_p2 = scmp.lt.s32.totalorder %s3936_s23, %s3930_s15 }
  0xb5   : > { %622 = vmatpush1.bf16.msra.mxu0 %v3226_v13  ;;  %2980 = vmatprep.subr.bf16.mxu1 %v3240_v20  ;;  %v426_v61 = vld [vmem:[%s4297_s30 + $0x70] sm:$0xff]  ;;  %v427_v62 = vld [vmem:[%s4297_s30 + $0x78] sm:$0xff]  ;;  %v3270_v2 = vld [vmem:[#allocation7 + $0x84] ss:$8 sps:$4 sm:$0xff]   ;;  %s4854_s30 = scalar_lea.hbm %s4912_s9, %s2875_s27 }
  0xb6   : > { %623 = vmatprep.subr.bf16.mxu0 %v3228_v17  ;;  %v3265_v63 = vld [vmem:[#allocation7 + $0x70] ss:$8 sps:$4 sm:$0xff]   ;;  %v435_v1 = vpack.c.bf16 %v427_v62, %v426_v61  ;;  %v3268_v3 = vld [vmem:[#allocation7 + $0x80] ss:$8 sps:$4 sm:$0xff]   ;;  %v3273_v4 = vld [vmem:[#allocation7 + $0x94] ss:$8 sps:$4 sm:$0xff]   ;;  %p3939_p1 = por %p3938_p2, %p3937_p12 }
  0xb7   : > { %v3271_v5 = vld [vmem:[#allocation7 + $0x90] ss:$8 sps:$4 sm:$0xff]   ;;  %v3276_v6 = vld [vmem:[#allocation7 + $0xa4] ss:$8 sps:$4 sm:$0xff]   ;;  %v3274_v7 = vld [vmem:[#allocation7 + $0xa0] ss:$8 sps:$4 sm:$0xff]  }
  0xb8   : > { %2981 = vmatpush3.bf16.msra.mxu1 %v3240_v20  ;;  %v3279_v8 = vld [vmem:[#allocation7 + $0xb4] ss:$8 sps:$4 sm:$0xff]   ;;  %v3277_v9 = vld [vmem:[#allocation7 + $0xb0] ss:$8 sps:$4 sm:$0xff]   ;;  %v3282_v10 = vld [vmem:[#allocation7 + $0xc4] ss:$8 sps:$4 sm:$0xff]   ;;  %p3940_p13 = pnand %p3939_p1, %p3933_p7 }
  0xb9   : > { %624 = vmatpush1.bf16.msra.mxu0 %v3230_v19  ;;  %2982 = vmatprep.subr.bf16.mxu1 %v3241_v23  ;;  %v3280_v11 = vld [vmem:[#allocation7 + $0xc0] ss:$8 sps:$4 sm:$0xff]   ;;  %v3285_v12 = vld [vmem:[#allocation7 + $0xd4] ss:$8 sps:$4 sm:$0xff]   ;;  %v3283_v13 = vld [vmem:[#allocation7 + $0xd0] ss:$8 sps:$4 sm:$0xff]  }
  0xba   : > { %625 = vmatprep.subr.bf16.mxu0 %v3232_v21  ;;  %v3288_v14 = vld [vmem:[#allocation7 + $0xe4] ss:$8 sps:$4 sm:$0xff]   ;;  %v3286_v15 = vld [vmem:[#allocation7 + $0xe0] ss:$8 sps:$4 sm:$0xff]   ;;  %v3291_v16 = vld [vmem:[#allocation7 + $0xf4] ss:$8 sps:$4 sm:$0xff]  }
  0xbb   : > { %v3289_v17 = vld [vmem:[#allocation7 + $0xf0] ss:$8 sps:$4 sm:$0xff]   ;;  %v4336_v19 = vld [vmem:[#allocation7 + $0x100] ss:$8 sps:$4 sm:$0xff]   ;;  %v4339_v20 = vld [vmem:[#allocation7 + $0x114] ss:$8 sps:$4 sm:$0xff]  }
  0xbc   : > { %2983 = vmatpush3.bf16.msra.mxu1 %v3241_v23  ;;  %v4341_v21 = vld [vmem:[#allocation7 + $0x110] ss:$8 sps:$4 sm:$0xff]   ;;  %v4347_v23 = vld [vmem:[#allocation7 + $0x120] ss:$8 sps:$4 sm:$0xff]   ;;  %v4375_v32 = vld [vmem:[#allocation7 + $0x174] ss:$8 sps:$4 sm:$0xff]  }
  0xbd   : > { %626 = vmatpush1.bf16.msra.mxu0 %v3234_v22  ;;  %2984 = vmatprep.subr.bf16.mxu1 %v3242_v26  ;;  %v4345_v22 = vld [vmem:[#allocation7 + $0x124] ss:$8 sps:$4 sm:$0xff]   ;;  %v4371_v31 = vld [vmem:[#allocation7 + $0x160] ss:$8 sps:$4 sm:$0xff]  }
  0xbe   : > { %627 = vmatprep.subr.bf16.mxu0 %v3236_v24  ;;  %v4351_v24 = vld [vmem:[#allocation7 + $0x134] ss:$8 sps:$4 sm:$0xff]  }
  0xc0   : > { %2985 = vmatpush3.bf16.msra.mxu1 %v3242_v26  ;;  %v4357_v26 = vld [vmem:[#allocation7 + $0x144] ss:$8 sps:$4 sm:$0xff]  }
  0xc1   : > { %628 = vmatpush1.bf16.msra.mxu0 %v3238_v25  ;;  %2986 = vmatprep.subr.bf16.mxu1 %v3243_v28  ;;  %v4353_v25 = vld [vmem:[#allocation7 + $0x130] ss:$8 sps:$4 sm:$0xff]  }
  0xc2   : > { %1435 = vmatprep.subr.bf16.mxu0 %v3246_v27  ;;  %v4359_v27 = vld [vmem:[#allocation7 + $0x140] ss:$8 sps:$4 sm:$0xff]  }
  0xc4   : > { %646 = vmatmul.mubr.bf16.vlgmr.msra.gmra.mrb[0].mxu0 %v428_v18  ;;  %2987 = vmatpush3.bf16.msra.mxu1 %v3243_v28  ;;  %v3294_v18 = vld [vmem:[#allocation7 + $0x104] ss:$8 sps:$4 sm:$0xff]   ;;  %v4363_v28 = vld [vmem:[#allocation7 + $0x154] ss:$8 sps:$4 sm:$0xff]  }
  0xc5   : > { %655 = vmatprep.mubr.bf16.mxu0 %v4017_v0  ;;  %1436 = vmatpush1.bf16.msra.mxu0 %v3244_v29  ;;  %v4365_v29 = vld [vmem:[#allocation7 + $0x150] ss:$8 sps:$4 sm:$0xff]  }
  0xc6   : > { %1437 = vmatprep.subr.bf16.mxu0 %v3249_v30  ;;  %3036 = vmatprep.subr.bf16.mxu1 %v3294_v18  ;;  %v4369_v30 = vld [vmem:[#allocation7 + $0x164] ss:$8 sps:$4 sm:$0xff]  }
  0xc7   : > { %2989 = vmatmul.mubr.bf16.vlgmr.msra.gmra.mrb[0].mxu1 %v429_v37 }
  0xc8   : > { %2992 = vmatprep.mubr.bf16.mxu1 %v430_v40  ;;  %3044 = vmatpush1.bf16.msra.mxu1 %v4336_v19 }
  0xc9   : > { %1438 = vmatpush1.bf16.msra.mxu0 %v3247_v33  ;;  %3037 = vmatprep.subr.bf16.mxu1 %v4339_v20  ;;  %v4377_v33 = vld [vmem:[#allocation7 + $0x170] ss:$8 sps:$4 sm:$0xff]  }
  0xca   : > { %1439 = vmatprep.subr.bf16.mxu0 %v3252_v36  ;;  %v472_v36 = vsub.s32 0, %v4381_v35 }
  0xcc   : > { %656 = vmatmul.mubr.bf16.gmra.mrb[4].mxu0 %v429_v37  ;;  %3045 = vmatpush1.bf16.msra.mxu1 %v4341_v21  ;;  %v468_v37 = vld [vmem:[%s4905_s2] sm:$0x7] }
  0xcd   : > { %665 = vmatprep.mubr.bf16.mxu0 %v4017_v0  ;;  %1440 = vmatpush1.bf16.msra.mxu0 %v3250_v38  ;;  %v476_v38 = vsub.s32 1, %v4381_v35 }
  0xce   : > { %1441 = vmatprep.subr.bf16.mxu0 %v3255_v39  ;;  %3038 = vmatprep.subr.bf16.mxu1 %v4345_v22  ;;  %v4390_v39 = vrot.slane %v468_v37, %v472_v36 }
  0xcf   : > { %2993 = vmatmul.mubr.bf16.gmra.mrb[4].mxu1 %v431_v48 }
  0xd0   : > { %2996 = vmatprep.mubr.bf16.mxu1 %v432_v50  ;;  %3046 = vmatpush1.bf16.msra.mxu1 %v4347_v23 }
  0xd1   : > { %1442 = vmatpush1.bf16.msra.mxu0 %v3253_v43  ;;  %3039 = vmatprep.subr.bf16.mxu1 %v4351_v24 }
  0xd2   : > { %1443 = vmatprep.subr.bf16.mxu0 %v3258_v46  ;;  %v480_v46 = vsub.s32 2, %v4381_v35 }
  0xd4   : > { %666 = vmatmul.mubr.bf16.gmra.mrb[8].mxu0 %v430_v40  ;;  %3047 = vmatpush1.bf16.msra.mxu1 %v4353_v25  ;;  %v4394_v40 = vrot.slane %v468_v37, %v476_v38  ;;  %v4401_v54 = vrot.slane %v468_v37, %v480_v46 }
  0xd5   : > { %675 = vmatprep.mubr.bf16.mxu0 %v4017_v0  ;;  %1444 = vmatpush1.bf16.msra.mxu0 %v3256_v47 }
  0xd6   : > { %1445 = vmatprep.subr.bf16.mxu0 %v3261_v49  ;;  %3040 = vmatprep.subr.bf16.mxu1 %v4357_v26 }
  0xd7   : > { %2997 = vmatmul.mubr.bf16.gmra.mrb[8].mxu1 %v433_v57 }
  0xd8   : > { %3000 = vmatprep.mubr.bf16.mxu1 %v434_v60  ;;  %3048 = vmatpush1.bf16.msra.mxu1 %v4359_v27 }
  0xd9   : > { %1446 = vmatpush1.bf16.msra.mxu0 %v3259_v53  ;;  %3041 = vmatprep.subr.bf16.mxu1 %v4363_v28 }
  0xda   : > { %1447 = vmatprep.subr.bf16.mxu0 %v3264_v56 }
  0xdc   : > { %676 = vmatmul.mubr.bf16.gmra.mrb[12].mxu0 %v431_v48  ;;  %3049 = vmatpush1.bf16.msra.mxu1 %v4365_v29 }
  0xdd   : > { %685 = vmatprep.mubr.bf16.mxu0 %v4017_v0  ;;  %1448 = vmatpush1.bf16.msra.mxu0 %v3262_v58 }
  0xde   : > { %1449 = vmatprep.subr.bf16.mxu0 %v3267_v59  ;;  %3042 = vmatprep.subr.bf16.mxu1 %v4369_v30 }
  0xdf   : > { %3001 = vmatmul.mubr.bf16.gmra.mrb[12].mxu1 %v435_v1 }
  0xe0   : > { %1620 = vmatprep.mubr.bf16.mxu1 %v4017_v0  ;;  %3050 = vmatpush1.bf16.msra.mxu1 %v4371_v31 }
  0xe1   : > { %1450 = vmatpush1.bf16.msra.mxu0 %v3265_v63  ;;  %3043 = vmatprep.subr.bf16.mxu1 %v4375_v32 }
  0xe2   : > { %1451 = vmatprep.subr.bf16.mxu0 %v3270_v2 }
  0xe4   : > { %686 = vmatmul.mubr.bf16.gmra.mrb[16].mxu0 %v432_v50  ;;  %3051 = vmatpush1.bf16.msra.mxu1 %v4377_v33 }
  0xe5   : > { %695 = vmatprep.mubr.bf16.mxu0 %v4017_v0  ;;  %1452 = vmatpush1.bf16.msra.mxu0 %v3268_v3 }
  0xe6   : > { %1453 = vmatprep.subr.bf16.mxu0 %v3273_v4 }
  0xe9   : > { %1454 = vmatpush1.bf16.msra.mxu0 %v3271_v5 }
  0xea   : > { %1455 = vmatprep.subr.bf16.mxu0 %v3276_v6 }
  0xec   : > { %696 = vmatmul.mubr.bf16.gmra.mrb[20].mxu0 %v433_v57 }
  0xed   : > { %705 = vmatprep.mubr.bf16.mxu0 %v4017_v0  ;;  %1456 = vmatpush1.bf16.msra.mxu0 %v3274_v7 }
  0xee   : > { %1457 = vmatprep.subr.bf16.mxu0 %v3279_v8 }
  0xf1   : > { %1458 = vmatpush1.bf16.msra.mxu0 %v3277_v9 }
  0xf2   : > { %1459 = vmatprep.subr.bf16.mxu0 %v3282_v10 }
  0xf4   : > { %706 = vmatmul.mubr.bf16.gmra.mrb[24].mxu0 %v434_v60 }
  0xf5   : > { %715 = vmatprep.mubr.bf16.mxu0 %v4017_v0  ;;  %1460 = vmatpush1.bf16.msra.mxu0 %v3280_v11 }
  0xf6   : > { %1461 = vmatprep.subr.bf16.mxu0 %v3285_v12 }
  0xf9   : > { %1462 = vmatpush1.bf16.msra.mxu0 %v3283_v13 }
  0xfa   : > { %1463 = vmatprep.subr.bf16.mxu0 %v3288_v14 }
  0xfc   : > { %716 = vmatmul.mubr.bf16.gmra.mrb[28].mxu0 %v435_v1 }
  0xfd   : > { %1464 = vmatpush1.bf16.msra.mxu0 %v3286_v15 }
  0xfe   : > { %1465 = vmatprep.subr.bf16.mxu0 %v3291_v16 }
 0x101   : > { %1466 = vmatpush1.bf16.msra.mxu0 %v3289_v17 }
 0x102   : > { %1548 = vmatprep.subr.bf16.mxu0 %v3294_v18 }
 0x197   : > { %v647_v41 = vpop.f32.mrb[0].mxu0 }
 0x198   : > { %v648_v42 = vadd.f32 %v647_v41, %v4390_v39  ;;  %v649_v43 = vpop.f32.mrb[1].mxu0 }
 0x199   : > { %v650_v44 = vadd.f32 %v649_v43, %v4394_v40  ;;  %v651_v45 = vpop.f32.mrb[2].mxu0 }
 0x19a   : > { %v2699_v47 = vmul.f32 -1.442695, %v648_v42  ;;  %v652_v48 = vadd.f32 %v651_v45, %v4390_v39  ;;  %v653_v49 = vpop.f32.mrb[3].mxu0  ;;  %v2990_v55 = vpop.f32.mrb[0].mxu1 }
 0x19b   : > { %v2700_v50 = vmul.f32 -1.442695, %v650_v44  ;;  %v654_v51 = vadd.f32 %v653_v49, %v4394_v40  ;;  %v769_v57 = vadd.f32 %v2990_v55, %v4401_v54  ;;  %v760_v58 = vpop.f32.mrb[1].mxu1 }
 0x19c   : > { %3340 = vpow2.f32 %v2699_v47  ;;  %v2702_v52 = vmul.f32 -1.442695, %v652_v48  ;;  %v761_v61 = vadd.f32 %v760_v58, %v4401_v54  ;;  %v4406_v62 = vpop.f32.mrb[2].mxu1 }
 0x19d   : > { %3342 = vpow2.f32 %v2700_v50  ;;  %v2703_v53 = vmul.f32 -1.442695, %v654_v51  ;;  %v2707_v2 = vmul.f32 -1.442695, %v769_v57  ;;  %v4409_v3 = vpop.f32.mrb[3].mxu1 }
 0x19e   : > { %3344 = vpow2.f32 %v2702_v52  ;;  %v2701_v10 = vmul.f32 -1.442695, %v761_v61 }
 0x19f   : > { %3346 = vpow2.f32 %v2703_v53  ;;  %v657_v56 = vpop.f32.mrb[4].mxu0 }
 0x1a0   : > { %v658_v59 = vadd.f32 %v657_v56, %v4390_v39  ;;  %v659_v60 = vpop.f32.mrb[5].mxu0  ;;  %3348 = vpow2.f32 %v2707_v2 }
 0x1a1   : > { %v660_v63 = vadd.f32 %v659_v60, %v4394_v40  ;;  %v661_v1 = vpop.f32.mrb[6].mxu0 }
 0x1a2   : > { %v2705_v4 = vmul.f32 -1.442695, %v658_v59  ;;  %v662_v5 = vadd.f32 %v661_v1, %v4390_v39  ;;  %v663_v6 = vpop.f32.mrb[7].mxu0  ;;  %v2994_v13 = vpop.f32.mrb[4].mxu1 }
 0x1a3   : > { %v2706_v7 = vmul.f32 -1.442695, %v660_v63  ;;  %v664_v8 = vadd.f32 %v663_v6, %v4394_v40  ;;  %v4414_v17 = vadd.f32 %v2994_v13, %v4401_v54  ;;  %v4416_v18 = vpop.f32.mrb[5].mxu1 }
 0x1a4   : > { %3350 = vpow2.f32 %v2705_v4  ;;  %v2708_v9 = vmul.f32 -1.442695, %v662_v5  ;;  %v2995_v43 = vpop.f32.mrb[6].mxu1 }
 0x1a5   : > { %3352 = vpow2.f32 %v2706_v7  ;;  %v2709_v11 = vmul.f32 -1.442695, %v664_v8  ;;  %v4420_v48 = vpop.f32.mrb[7].mxu1  ;;  %v4425_v57 = vadd.f32 %v2995_v43, %v4401_v54 }
 0x1a6   : > { %v3341_v12 = vpop.eup %3340  ;;  %3354 = vpow2.f32 %v2708_v9 }
 0x1a7   : > { %v3343_v14 = vpop.eup %3342  ;;  %v967_v15 = vadd.f32 1.0, %v3341_v12  ;;  %3356 = vpow2.f32 %v2709_v11  ;;  %v667_v16 = vpop.f32.mrb[8].mxu0 }
 0x1a8   : > { %v3345_v34 = vpop.eup %3344  ;;  %v968_v37 = vadd.f32 1.0, %v3343_v14  ;;  %v668_v41 = vadd.f32 %v667_v16, %v4390_v39  ;;  %v669_v42 = vpop.f32.mrb[9].mxu0  ;;  %3358 = vpow2.f32 %v2701_v10 }
 0x1a9   : > { %v3347_v44 = vpop.eup %3346  ;;  %3360 = vrcp.f32 %v967_v15  ;;  %v970_v45 = vadd.f32 1.0, %v3345_v34  ;;  %v670_v46 = vadd.f32 %v669_v42, %v4394_v40  ;;  %v671_v47 = vpop.f32.mrb[10].mxu0 }
 0x1aa   : > { %3362 = vrcp.f32 %v968_v37  ;;  %v971_v49 = vadd.f32 1.0, %v3347_v44  ;;  %v2711_v50 = vmul.f32 -1.442695, %v668_v41  ;;  %v672_v51 = vadd.f32 %v671_v47, %v4390_v39  ;;  %v673_v52 = vpop.f32.mrb[11].mxu0  ;;  %v3349_v58 = vpop.eup %3348 }
 0x1ab   : > { %3364 = vrcp.f32 %v970_v45  ;;  %v2712_v53 = vmul.f32 -1.442695, %v670_v46  ;;  %v674_v55 = vadd.f32 %v673_v52, %v4394_v40  ;;  %v4427_v61 = vpop.f32.mrb[8].mxu1 }
 0x1ac   : > { %3366 = vrcp.f32 %v971_v49  ;;  %v2714_v56 = vmul.f32 -1.442695, %v672_v51  ;;  %v4429_v4 = vpop.f32.mrb[9].mxu1 }
 0x1ad   : > { %3368 = vpow2.f32 %v2711_v50  ;;  %v2715_v59 = vmul.f32 -1.442695, %v674_v55  ;;  %v4432_v9 = vpop.f32.mrb[10].mxu1  ;;  %v975_v50 = vadd.f32 1.0, %v3349_v58  ;;  %v764_v58 = vadd.f32 %v4409_v3, %v4401_v54 }
 0x1ae   : > { %v3351_v60 = vpop.eup %3350  ;;  %3370 = vpow2.f32 %v2712_v53  ;;  %v4435_v14 = vpop.f32.mrb[11].mxu1 }
 0x1af   : > { %v3353_v63 = vpop.eup %3352  ;;  %v973_v1 = vadd.f32 1.0, %v3351_v60  ;;  %3372 = vpow2.f32 %v2714_v56  ;;  %v677_v2 = vpop.f32.mrb[12].mxu0  ;;  %v772_v56 = vadd.f32 %v4406_v62, %v4401_v54 }
 0x1b0   : > { %v3355_v5 = vpop.eup %3354  ;;  %v974_v6 = vadd.f32 1.0, %v3353_v63  ;;  %3374 = vpow2.f32 %v2715_v59  ;;  %v678_v7 = vadd.f32 %v677_v2, %v4390_v39  ;;  %v679_v8 = vpop.f32.mrb[13].mxu0 }
 0x1b1   : > { %v3357_v10 = vpop.eup %3356  ;;  %3376 = vrcp.f32 %v973_v1  ;;  %v976_v11 = vadd.f32 1.0, %v3355_v5  ;;  %v680_v12 = vadd.f32 %v679_v8, %v4394_v40  ;;  %v681_v13 = vpop.f32.mrb[14].mxu0 }
 0x1b2   : > { %v3359_v15 = vpop.eup %3358  ;;  %3378 = vrcp.f32 %v974_v6  ;;  %v977_v16 = vadd.f32 1.0, %v3357_v10  ;;  %v2717_v34 = vmul.f32 -1.442695, %v678_v7  ;;  %v682_v37 = vadd.f32 %v681_v13, %v4390_v39  ;;  %v683_v41 = vpop.f32.mrb[15].mxu0 }
 0x1b3   : > { %v3361_v42 = vpop.eup %3360  ;;  %3380 = vrcp.f32 %v976_v11  ;;  %v2718_v43 = vmul.f32 -1.442695, %v680_v12  ;;  %v684_v44 = vadd.f32 %v683_v41, %v4394_v40  ;;  %v4439_v53 = vpop.f32.mrb[12].mxu1  ;;  %v969_v13 = vadd.f32 1.0, %v3359_v15 }
 0x1b4   : > { %v3363_v45 = vpop.eup %3362  ;;  %3382 = vrcp.f32 %v977_v16  ;;  %v2720_v46 = vmul.f32 -1.442695, %v682_v37  ;;  %v4443_v63 = vpop.f32.mrb[13].mxu1  ;;  %v2710_v37 = vmul.f32 -1.442695, %v772_v56  ;;  %v777_v41 = vadd.f32 %v4416_v18, %v4401_v54 }
 0x1b5   : > { %v3365_v47 = vpop.eup %3364  ;;  %3384 = vpow2.f32 %v2717_v34  ;;  %v2721_v49 = vmul.f32 -1.442695, %v684_v44  ;;  %v4447_v6 = vpop.f32.mrb[14].mxu1  ;;  %v2719_v15 = vmul.f32 -1.442695, %v4414_v17 }
 0x1b6   : > { %v3367_v51 = vpop.eup %3366  ;;  %3386 = vpow2.f32 %v2718_v43  ;;  %v1111_v52 = vpack.c.bf16 %v3365_v47, %v3361_v42  ;;  %v4449_v11 = vpop.f32.mrb[15].mxu1  ;;  %v2704_v43 = vmul.f32 -1.442695, %v764_v58 }
 0x1b7   : > { %v3369_v55 = vpop.eup %3368  ;;  %3388 = vpow2.f32 %v2720_v46  ;;  %v687_v59 = vpop.f32.mrb[16].mxu0  ;;  %v1112_v60 = vpack.c.bf16 %v3367_v51, %v3363_v45 }
 0x1b8   : > { %v3371_v1 = vpop.eup %3370  ;;  %v979_v2 = vadd.f32 1.0, %v3369_v55  ;;  %3390 = vpow2.f32 %v2721_v49  ;;  %v689_v5 = vpop.f32.mrb[17].mxu0  ;;  %v688_v45 = vadd.f32 %v687_v59, %v4390_v39 }
 0x1b9   : > { %v3373_v7 = vpop.eup %3372  ;;  %v980_v8 = vadd.f32 1.0, %v3371_v1  ;;  %3392 = vrcp.f32 %v975_v50  ;;  %v691_v10 = vpop.f32.mrb[18].mxu0  ;;  %1467 = vmatprep.mubr.bf16.mxu0 %v1112_v60  ;;  %v2713_v50 = vmul.f32 -1.442695, %v777_v41 }
 0x1ba   : > { %v3375_v62 = vpop.eup %3374  ;;  %3394 = vrcp.f32 %v979_v2  ;;  %v982_v12 = vadd.f32 1.0, %v3373_v7  ;;  %v4451_v16 = vpop.f32.mrb[19].mxu0  ;;  %1468 = vmatmul.mubr.bf16.vlgmr.msra.gmra.mrb[32].mxu0 %v1111_v52  ;;  %v2723_v60 = vmul.f32 -1.442695, %v688_v45 }
 0x1bb   : > { %v3377_v34 = vpop.eup %3376  ;;  %3396 = vrcp.f32 %v980_v8  ;;  %v983_v3 = vadd.f32 1.0, %v3375_v62  ;;  %1549 = vmatpush1.bf16.msra.mxu0 %v4336_v19 }
 0x1bc   : > { %v3379_v42 = vpop.eup %3378  ;;  %3398 = vrcp.f32 %v982_v12  ;;  %1550 = vmatprep.subr.bf16.mxu0 %v4339_v20  ;;  %v690_v20 = vadd.f32 %v689_v5, %v4394_v40  ;;  %v692_v5 = vadd.f32 %v691_v10, %v4390_v39  ;;  %v780_v12 = vadd.f32 %v4420_v48, %v4401_v54 }
 0x1bd   : > { %v3381_v44 = vpop.eup %3380  ;;  %3400 = vrcp.f32 %v983_v3 }
 0x1be   : > { %v3383_v46 = vpop.eup %3382  ;;  %3402 = vrcp.f32 %v969_v13  ;;  %v1114_v47 = vpack.c.bf16 %v3381_v44, %v3377_v34  ;;  %v2724_v10 = vmul.f32 -1.442695, %v690_v20  ;;  %v2716_v48 = vmul.f32 -1.442695, %v780_v12 }
 0x1bf   : > { %v3385_v49 = vpop.eup %3384  ;;  %3404 = vpow2.f32 %v2710_v37  ;;  %v697_v18 = vpop.f32.mrb[20].mxu0  ;;  %v1115_v51 = vpack.c.bf16 %v3383_v46, %v3379_v42  ;;  %1551 = vmatpush1.bf16.msra.mxu0 %v4341_v21  ;;  %v2722_v37 = vmul.f32 -1.442695, %v4425_v57  ;;  %v2726_v42 = vmul.f32 -1.442695, %v692_v5 }
 0x1c0   : > { %v3387_v19 = vpop.eup %3386  ;;  %v985_v52 = vadd.f32 1.0, %v3385_v49  ;;  %3406 = vpow2.f32 %v2704_v43  ;;  %v4462_v55 = vadd.f32 %v697_v18, %v4390_v39  ;;  %v699_v17 = vpop.f32.mrb[21].mxu0  ;;  %1552 = vmatprep.subr.bf16.mxu0 %v4345_v22  ;;  %v694_v44 = vadd.f32 %v4451_v16, %v4394_v40 }
 0x1c1   : > { %v3389_v56 = vpop.eup %3388  ;;  %v986_v59 = vadd.f32 1.0, %v3387_v19  ;;  %3408 = vpow2.f32 %v2719_v15  ;;  %v4466_v1 = vadd.f32 %v699_v17, %v4394_v40  ;;  %v701_v2 = vpop.f32.mrb[22].mxu0  ;;  %1477 = vmatprep.mubr.bf16.mxu0 %v1115_v51  ;;  %v793_v16 = vadd.f32 %v4429_v4, %v4401_v54 }
 0x1c2   : > { %v3391_v21 = vpop.eup %3390  ;;  %3410 = vrcp.f32 %v985_v52  ;;  %v988_v58 = vadd.f32 1.0, %v3389_v56  ;;  %v4470_v7 = vadd.f32 %v701_v2, %v4390_v39  ;;  %v703_v8 = vpop.f32.mrb[23].mxu0  ;;  %1478 = vmatmul.mubr.bf16.gmra.mrb[36].mxu0 %v1114_v47  ;;  %v2727_v17 = vmul.f32 -1.442695, %v694_v44 }
 0x1c3   : > { %v4472_v22 = vpop.eup %3392  ;;  %3412 = vrcp.f32 %v986_v59  ;;  %v989_v62 = vadd.f32 1.0, %v3391_v21  ;;  %v4477_v13 = vadd.f32 %v703_v8, %v4394_v40  ;;  %1553 = vmatpush1.bf16.msra.mxu0 %v4347_v23  ;;  %v2725_v2 = vmul.f32 -1.442695, %v793_v16 }
 0x1c4   : > { %v3395_v34 = vpop.eup %3394  ;;  %3414 = vrcp.f32 %v988_v58  ;;  %1554 = vmatprep.subr.bf16.mxu0 %v4351_v24  ;;  %v801_v24 = vadd.f32 %v4427_v61, %v4401_v54  ;;  %v804_v61 = vadd.f32 %v4432_v9, %v4401_v54 }
 0x1c5   : > { %v3397_v3 = vpop.eup %3396  ;;  %3416 = vrcp.f32 %v989_v62 }
 0x1c6   : > { %v3399_v41 = vpop.eup %3398  ;;  %3418 = vpow2.f32 %v2723_v60  ;;  %v2731_v60 = vmul.f32 -1.442695, %v801_v24  ;;  %v2734_v58 = vmul.f32 -1.442695, %v804_v61 }
 0x1c7   : > { %v3401_v43 = vpop.eup %3400  ;;  %3420 = vpow2.f32 %v2713_v50  ;;  %v707_v15 = vpop.f32.mrb[24].mxu0  ;;  %v1117_v23 = vpack.c.bf16 %v3399_v41, %v3395_v34  ;;  %1555 = vmatpush1.bf16.msra.mxu0 %v4353_v25 }
 0x1c8   : > { %v4485_v45 = vpop.eup %3402  ;;  %3422 = vpow2.f32 %v2724_v10  ;;  %v4490_v57 = vadd.f32 %v707_v15, %v4390_v39  ;;  %v709_v46 = vpop.f32.mrb[25].mxu0  ;;  %v1118_v47 = vpack.c.bf16 %v3401_v43, %v3397_v3  ;;  %1556 = vmatprep.subr.bf16.mxu0 %v4357_v26 }
 0x1c9   : > { %v3405_v49 = vpop.eup %3404  ;;  %3424 = vpow2.f32 %v2722_v37  ;;  %v4496_v25 = vadd.f32 %v709_v46, %v4394_v40  ;;  %v711_v50 = vpop.f32.mrb[26].mxu0 }
 0x1ca   : > { %v3407_v18 = vpop.eup %3406  ;;  %v978_v51 = vadd.f32 1.0, %v3405_v49  ;;  %3426 = vpow2.f32 %v2726_v42  ;;  %v4501_v19 = vadd.f32 %v711_v50, %v4390_v39  ;;  %1487 = vmatprep.mubr.bf16.mxu0 %v1118_v47  ;;  %v713_v26 = vpop.f32.mrb[27].mxu0  ;;  %v2729_v50 = vmul.f32 -1.442695, %v4462_v55 }
 0x1cb   : > { %v3409_v52 = vpop.eup %3408  ;;  %v972_v20 = vadd.f32 1.0, %v3407_v18  ;;  %3428 = vpow2.f32 %v2716_v48  ;;  %v4504_v4 = vadd.f32 %v713_v26, %v4394_v40  ;;  %1488 = vmatmul.mubr.bf16.gmra.mrb[40].mxu0 %v1117_v23  ;;  %v2730_v18 = vmul.f32 -1.442695, %v4466_v1 }
 0x1cc   : > { %v3411_v56 = vpop.eup %3410  ;;  %3430 = vrcp.f32 %v978_v51  ;;  %v987_v59 = vadd.f32 1.0, %v3409_v52  ;;  %1557 = vmatpush1.bf16.msra.mxu0 %v4359_v27 }
 0x1cd   : > { %v3413_v9 = vpop.eup %3412  ;;  %3432 = vrcp.f32 %v972_v20  ;;  %1558 = vmatprep.subr.bf16.mxu0 %v4363_v28  ;;  %v796_v28 = vadd.f32 %v4435_v14, %v4401_v54 }
 0x1ce   : > { %v3415_v21 = vpop.eup %3414  ;;  %3434 = vrcp.f32 %v987_v59 }
 0x1cf   : > { %v3417_v5 = vpop.eup %3416  ;;  %3436 = vpow2.f32 %v2727_v17  ;;  %v717_v8 = vpop.f32.mrb[28].mxu0  ;;  %v1120_v62 = vpack.c.bf16 %v3415_v21, %v3411_v56  ;;  %v2728_v49 = vmul.f32 -1.442695, %v796_v28  ;;  %v2732_v56 = vmul.f32 -1.442695, %v4470_v7 }
 0x1d0   : > { %v3419_v12 = vpop.eup %3418  ;;  %3438 = vpow2.f32 %v2731_v60  ;;  %v4509_v34 = vadd.f32 %v717_v8, %v4390_v39  ;;  %v719_v10 = vpop.f32.mrb[29].mxu0  ;;  %v1121_v3 = vpack.c.bf16 %v3417_v5, %v3413_v9  ;;  %1559 = vmatpush1.bf16.msra.mxu0 %v4365_v29  ;;  %v2738_v8 = vmul.f32 -1.442695, %v4501_v19 }
 0x1d1   : > { %v3421_v27 = vpop.eup %3420  ;;  %v991_v37 = vadd.f32 1.0, %v3419_v12  ;;  %3440 = vpow2.f32 %v2725_v2  ;;  %v4515_v41 = vadd.f32 %v719_v10, %v4394_v40  ;;  %v721_v42 = vpop.f32.mrb[30].mxu0  ;;  %1560 = vmatprep.subr.bf16.mxu0 %v4369_v30  ;;  %v2735_v2 = vmul.f32 -1.442695, %v4490_v57 }
 0x1d2   : > { %v3423_v43 = vpop.eup %3422  ;;  %v981_v48 = vadd.f32 1.0, %v3421_v27  ;;  %3442 = vpow2.f32 %v2734_v58  ;;  %v4519_v44 = vadd.f32 %v721_v42, %v4390_v39  ;;  %1497 = vmatprep.mubr.bf16.mxu0 %v1121_v3  ;;  %v723_v29 = vpop.f32.mrb[31].mxu0  ;;  %v2736_v58 = vmul.f32 -1.442695, %v4496_v25 }
 0x1d3   : > { %v3425_v15 = vpop.eup %3424  ;;  %3444 = vrcp.f32 %v991_v37  ;;  %v992_v23 = vadd.f32 1.0, %v3423_v43  ;;  %v4522_v24 = vadd.f32 %v723_v29, %v4394_v40  ;;  %1498 = vmatmul.mubr.bf16.gmra.mrb[44].mxu0 %v1120_v62  ;;  %v2739_v62 = vmul.f32 -1.442695, %v4504_v4 }
 0x1d4   : > { %v3427_v14 = vpop.eup %3426  ;;  %3446 = vrcp.f32 %v981_v48  ;;  %v990_v46 = vadd.f32 1.0, %v3425_v15  ;;  %1561 = vmatpush1.bf16.msra.mxu0 %v4371_v31  ;;  %v809_v25 = vadd.f32 %v4443_v63, %v4401_v54  ;;  %v820_v19 = vadd.f32 %v4447_v6, %v4401_v54 }
 0x1d5   : > { %v3429_v30 = vpop.eup %3428  ;;  %3448 = vrcp.f32 %v992_v23  ;;  %v994_v47 = vadd.f32 1.0, %v3427_v14  ;;  %1562 = vmatprep.subr.bf16.mxu0 %v4375_v32  ;;  %v812_v37 = vadd.f32 %v4449_v11, %v4401_v54 }
 0x1d6   : > { %v4526_v39 = vpop.eup %3430  ;;  %3450 = vrcp.f32 %v990_v46  ;;  %v984_v16 = vadd.f32 1.0, %v3429_v30  ;;  %v2737_v29 = vmul.f32 -1.442695, %v809_v25  ;;  %v2746_v6 = vmul.f32 -1.442695, %v820_v19 }
 0x1d7   : > { %v4529_v40 = vpop.eup %3432  ;;  %3452 = vrcp.f32 %v994_v47  ;;  %v1116_v31 = vpack.c.bf16 %v4526_v39, %v4472_v22  ;;  %v2740_v46 = vmul.f32 -1.442695, %v812_v37  ;;  %v2745_v25 = vmul.f32 -1.442695, %v4522_v24  ;;  %v3320_v22 = vld [vmem:[#allocation8 + $0x50] sm:$0xff]  }
 0x1d8   : > { %v4534_v51 = vpop.eup %3434  ;;  %3454 = vrcp.f32 %v984_v16  ;;  %1563 = vmatpush1.bf16.msra.mxu0 %v4377_v33  ;;  %v1113_v32 = vpack.c.bf16 %v4529_v40, %v4485_v45  ;;  %v2733_v33 = vmul.f32 -1.442695, %v4477_v13  ;;  %v817_v13 = vadd.f32 %v4439_v53, %v4401_v54  ;;  %v3316_v45 = vld [vmem:[#allocation8 + $0x40] sm:$0xff]   ;;  %v3321_v39 = vld [vmem:[#allocation8 + $0x10] sm:$0xff]  }
 0x1d9   : > { %v3437_v61 = vpop.eup %3436  ;;  %3456 = vpow2.f32 %v2728_v49  ;;  %v3317_v40 = vld [vmem:[#allocation8] sm:$0xff]   ;;  %2892 = vmatprep.subr.bf16.mxu1 %v3316_v45 }
 0x1da   : > { %v3439_v26 = vpop.eup %3438  ;;  %v995_v55 = vadd.f32 1.0, %v3437_v61  ;;  %3458 = vpow2.f32 %v2729_v50  ;;  %v2743_v43 = vmul.f32 -1.442695, %v817_v13 }
 0x1db   : > { %v3441_v52 = vpop.eup %3440  ;;  %v999_v20 = vadd.f32 1.0, %v3439_v26  ;;  %3460 = vpow2.f32 %v2730_v18 }
 0x1dc   : > { %v3443_v1 = vpop.eup %3442  ;;  %3462 = vrcp.f32 %v995_v55  ;;  %v993_v17 = vadd.f32 1.0, %v3441_v52 }
 0x1dd   : > { %v3445_v59 = vpop.eup %3444  ;;  %3464 = vrcp.f32 %v999_v20  ;;  %v1002_v60 = vadd.f32 1.0, %v3443_v1  ;;  %v2741_v1 = vmul.f32 -1.442695, %v4509_v34 }
 0x1de   : > { %v4541_v9 = vpop.eup %3446  ;;  %3466 = vrcp.f32 %v993_v17 }
 0x1df   : > { %v3449_v21 = vpop.eup %3448  ;;  %3468 = vrcp.f32 %v1002_v60 }
 0x1e0   : > { %v4545_v5 = vpop.eup %3450  ;;  %3470 = vpow2.f32 %v2732_v56 }
 0x1e1   : > { %v3453_v7 = vpop.eup %3452  ;;  %3472 = vpow2.f32 %v2733_v33  ;;  %v1122_v12 = vpack.c.bf16 %v4545_v5, %v4534_v51  ;;  %v2744_v33 = vmul.f32 -1.442695, %v4519_v44  ;;  %v3326_v51 = vld [vmem:[#allocation8 + $0x68] sm:$0xff]  }
 0x1e2   : > { %v4553_v57 = vpop.eup %3454  ;;  %3474 = vpow2.f32 %v2735_v2  ;;  %v1123_v10 = vpack.c.bf16 %v3453_v7, %v3445_v59  ;;  %v2742_v59 = vmul.f32 -1.442695, %v4515_v41  ;;  %v3327_v5 = vld [vmem:[#allocation8 + $0x28] sm:$0xff]  }
 0x1e3   : > { %v3457_v3 = vpop.eup %3456  ;;  %3476 = vpow2.f32 %v2736_v58  ;;  %v1119_v4 = vpack.c.bf16 %v4553_v57, %v4541_v9  ;;  %v3323_v9 = vld [vmem:[#allocation8 + $0x18] sm:$0xff]   ;;  %v3325_v57 = vld [vmem:[#allocation8 + $0x20] sm:$0xff]  }
 0x1e4   : > { %v3459_v27 = vpop.eup %3458  ;;  %v996_v53 = vadd.f32 1.0, %v3457_v3  ;;  %3478 = vpow2.f32 %v2738_v8 }
 0x1e5   : > { %v3461_v28 = vpop.eup %3460  ;;  %v997_v42 = vadd.f32 1.0, %v3459_v27  ;;  %3480 = vpow2.f32 %v2739_v62 }
 0x1e6   : > { %v3463_v63 = vpop.eup %3462  ;;  %3482 = vrcp.f32 %v996_v53  ;;  %v998_v48 = vadd.f32 1.0, %v3461_v28 }
 0x1e7   : > { %v4563_v15 = vpop.eup %3464  ;;  %3484 = vrcp.f32 %v997_v42  ;;  %v1124_v23 = vpack.c.bf16 %v3463_v63, %v3449_v21 }
 0x1e8   : > { %v3467_v14 = vpop.eup %3466  ;;  %3486 = vrcp.f32 %v998_v48 }
 0x1e9   : > { %v3469_v30 = vpop.eup %3468  ;;  %3488 = vpow2.f32 %v2743_v43  ;;  %1507 = vmatprep.mubr.bf16.mxu0 %v1124_v23 }
 0x1ea   : > { %v3471_v54 = vpop.eup %3470  ;;  %3490 = vpow2.f32 %v2737_v29  ;;  %1508 = vmatmul.mubr.bf16.gmra.mrb[48].mxu0 %v1123_v10  ;;  %v1128_v11 = vpack.c.bf16 %v3469_v30, %v4563_v15 }
 0x1eb   : > { %v3473_v47 = vpop.eup %3472  ;;  %v1000_v49 = vadd.f32 1.0, %v3471_v54  ;;  %3492 = vpow2.f32 %v2746_v6 }
 0x1ec   : > { %v3475_v16 = vpop.eup %3474  ;;  %v1001_v50 = vadd.f32 1.0, %v3473_v47  ;;  %3494 = vpow2.f32 %v2740_v46 }
 0x1ed   : > { %v3477_v18 = vpop.eup %3476  ;;  %3496 = vrcp.f32 %v1000_v49  ;;  %v1003_v61 = vadd.f32 1.0, %v3475_v16 }
 0x1ee   : > { %v3479_v26 = vpop.eup %3478  ;;  %3498 = vrcp.f32 %v1001_v50  ;;  %v1004_v55 = vadd.f32 1.0, %v3477_v18 }
 0x1ef   : > { %v3481_v52 = vpop.eup %3480  ;;  %3500 = vrcp.f32 %v1003_v61  ;;  %v1006_v20 = vadd.f32 1.0, %v3479_v26 }
 0x1f0   : > { %v3483_v17 = vpop.eup %3482  ;;  %3502 = vrcp.f32 %v1004_v55  ;;  %v1007_v56 = vadd.f32 1.0, %v3481_v52 }
 0x1f1   : > { %v3485_v60 = vpop.eup %3484  ;;  %3504 = vrcp.f32 %v1006_v20  ;;  %v1125_v2 = vpack.c.bf16 %v3483_v17, %v3467_v14  ;;  %v3319_v20 = vld [vmem:[#allocation8 + $0x8] sm:$0xff]   ;;  %v3331_v17 = vld [vmem:[#allocation8 + $0x38] sm:$0xff]  }
 0x1f2   : > { %v3487_v21 = vpop.eup %3486  ;;  %3506 = vrcp.f32 %v1007_v56  ;;  %v1183_v56 = vld [vmem:[%s4907_s4] sm:$0x3] }
 0x1f3   : > { %v3489_v58 = vpop.eup %3488  ;;  %3508 = vpow2.f32 %v2741_v1  ;;  %1621 = vmatmul.mubr.bf16.vlgmr.msra.gmra.mrb[16].mxu1 %v1125_v2  ;;  %v3330_v1 = vld [vmem:[#allocation8 + $0x78] sm:$0xff]  }
 0x1f4   : > { %v3491_v8 = vpop.eup %3490  ;;  %v1011_v7 = vadd.f32 1.0, %v3489_v58  ;;  %3510 = vpow2.f32 %v2742_v59  ;;  %1630 = vmatprep.mubr.bf16.mxu1 %v4017_v0  ;;  %2893 = vmatpush3.bf16.msra.mxu1 %v3317_v40 }
 0x1f5   : > { %v3493_v34 = vpop.eup %3492  ;;  %v1005_v62 = vadd.f32 1.0, %v3491_v8  ;;  %3512 = vpow2.f32 %v2744_v33  ;;  %v4594_v33 = vrot.slane %v1183_v56, %v472_v36 }
 0x1f6   : > { %v3495_v13 = vpop.eup %3494  ;;  %3514 = vrcp.f32 %v1011_v7  ;;  %v1014_v41 = vadd.f32 1.0, %v3493_v34 }
 0x1f7   : > { %v3497_v44 = vpop.eup %3496  ;;  %3516 = vrcp.f32 %v1005_v62  ;;  %v1008_v10 = vadd.f32 1.0, %v3495_v13 }
 0x1f8   : > { %v3499_v3 = vpop.eup %3498  ;;  %3518 = vrcp.f32 %v1014_v41  ;;  %v1126_v19 = vpack.c.bf16 %v3497_v44, %v3485_v60 }
 0x1f9   : > { %v3501_v27 = vpop.eup %3500  ;;  %3520 = vrcp.f32 %v1008_v10  ;;  %v1127_v53 = vpack.c.bf16 %v3499_v3, %v3487_v21  ;;  %v4598_v21 = vrot.slane %v1183_v56, %v476_v38 }
 0x1fa   : > { %v3503_v37 = vpop.eup %3502  ;;  %3522 = vpow2.f32 %v2745_v25 }
 0x1fb   : > { %v3505_v28 = vpop.eup %3504  ;;  %1517 = vmatprep.mubr.bf16.mxu0 %v1127_v53  ;;  %1631 = vmatmul.mubr.bf16.gmra.mrb[20].mxu1 %v1128_v11 }
 0x1fc   : > { %v3507_v42 = vpop.eup %3506  ;;  %1518 = vmatmul.mubr.bf16.gmra.mrb[52].mxu0 %v1126_v19  ;;  %v1129_v43 = vpack.c.bf16 %v3505_v28, %v3501_v27  ;;  %1640 = vmatprep.mubr.bf16.mxu1 %v4017_v0 }
 0x1fd   : > { %v3509_v24 = vpop.eup %3508  ;;  %v1130_v63 = vpack.c.bf16 %v3507_v42, %v3503_v37 }
 0x1fe   : > { %v3511_v48 = vpop.eup %3510  ;;  %v1009_v29 = vadd.f32 1.0, %v3509_v24 }
 0x1ff   : > { %v3513_v15 = vpop.eup %3512  ;;  %1527 = vmatprep.mubr.bf16.mxu0 %v1130_v63  ;;  %v1010_v30 = vadd.f32 1.0, %v3511_v48 }
 0x200   : > { %v3515_v6 = vpop.eup %3514  ;;  %v1012_v23 = vadd.f32 1.0, %v3513_v15  ;;  %3524 = vrcp.f32 %v1009_v29 }
 0x201   : > { %v3517_v14 = vpop.eup %3516 }
 0x202   : > { %v3519_v46 = vpop.eup %3518  ;;  %3526 = vrcp.f32 %v1012_v23 }
 0x203   : > { %v3521_v54 = vpop.eup %3520  ;;  %v1134_v11 = vpack.c.bf16 %v3519_v46, %v3515_v6  ;;  %3528 = vrcp.f32 %v1010_v30 }
 0x204   : > { %v3523_v47 = vpop.eup %3522  ;;  %1528 = vmatmul.mubr.bf16.gmra.mrb[56].mxu0 %v1129_v43  ;;  %v1131_v49 = vpack.c.bf16 %v3521_v54, %v3517_v14 }
 0x205   : > { %v1013_v16 = vadd.f32 1.0, %v3523_v47 }
 0x206   : > { %1641 = vmatmul.mubr.bf16.gmra.mrb[24].mxu1 %v1131_v49 }
 0x207   : > { %3530 = vrcp.f32 %v1013_v16  ;;  %1650 = vmatprep.mubr.bf16.mxu1 %v4017_v0 }
 0x20a   : > { %v3525_v50 = vpop.eup %3524 }
 0x20c   : > { %v3527_v18 = vpop.eup %3526 }
 0x20d   : > { %v1132_v61 = vpack.c.bf16 %v3527_v18, %v3525_v50  ;;  %v3529_v26 = vpop.eup %3528 }
 0x20e   : > { %1651 = vmatmul.mubr.bf16.gmra.mrb[28].mxu1 %v1134_v11 }
 0x211   : > { %v3531_v55 = vpop.eup %3530 }
 0x212   : > { %v1133_v52 = vpack.c.bf16 %v3531_v55, %v3529_v26 }
 0x214   : > { %1537 = vmatprep.mubr.bf16.mxu0 %v1133_v52 }
 0x215   : > { %1538 = vmatmul.mubr.bf16.gmra.mrb[60].mxu0 %v1132_v61 }
 0x216   : > { %1580 = vmatprep.mubr.bf16.mxu0 %v4017_v0 }
 0x21d   : > { %1581 = vmatmul.mubr.bf16.vlgmr.msra.gmra.mrb[32].mxu0 %v1113_v32  ;;  %v3318_v32 = vld [vmem:[#allocation8 + $0x48] sm:$0xff]  }
 0x21e   : > { %1590 = vmatprep.mubr.bf16.mxu0 %v4017_v0  ;;  %2894 = vmatprep.subr.bf16.mxu1 %v3318_v32 }
 0x21f   : > { %2895 = vmatpush3.bf16.msra.mxu1 %v3319_v20 }
 0x220   : > { %2896 = vmatprep.subr.bf16.mxu1 %v3320_v22 }
 0x223   : > { %2897 = vmatpush3.bf16.msra.mxu1 %v3321_v39 }
 0x225   : > { %1591 = vmatmul.mubr.bf16.gmra.mrb[36].mxu0 %v1116_v31  ;;  %v3322_v31 = vld [vmem:[#allocation8 + $0x58] sm:$0xff]  }
 0x226   : > { %1600 = vmatprep.mubr.bf16.mxu0 %v4017_v0  ;;  %2898 = vmatprep.subr.bf16.mxu1 %v3322_v31 }
 0x227   : > { %2899 = vmatpush3.bf16.msra.mxu1 %v3323_v9 }
 0x22d   : > { %1601 = vmatmul.mubr.bf16.gmra.mrb[40].mxu0 %v1119_v4  ;;  %v3329_v4 = vld [vmem:[#allocation8 + $0x30] sm:$0xff]  }
 0x22e   : > { %1610 = vmatprep.mubr.bf16.mxu0 %v4017_v0  ;;  %v3324_v0 = vld [vmem:[#allocation8 + $0x60] sm:$0xff]  }
 0x22f   : > { %2900 = vmatprep.subr.bf16.mxu1 %v3324_v0 }
 0x230   : > { %2901 = vmatpush3.bf16.msra.mxu1 %v3325_v57 }
 0x231   : > { %2902 = vmatprep.subr.bf16.mxu1 %v3326_v51 }
 0x234   : > { %2903 = vmatpush3.bf16.msra.mxu1 %v3327_v5 }
 0x235   : > { %1611 = vmatmul.mubr.bf16.gmra.mrb[44].mxu0 %v1122_v12  ;;  %v3328_v12 = vld [vmem:[#allocation8 + $0x70] sm:$0xff]  }
 0x236   : > { %2904 = vmatprep.subr.bf16.mxu1 %v3328_v12 }
 0x238   : > { %2905 = vmatpush3.bf16.msra.mxu1 %v3329_v4 }
 0x239   : > { %2906 = vmatprep.subr.bf16.mxu1 %v3330_v1 }
 0x23c   : > { %2907 = vmatpush3.bf16.msra.mxu1 %v3331_v17 }
 0x2bd   : > { %v1509_v59 = vpop.f32.mrb[48].mxu0 }
 0x2be   : > { %v1511_v60 = vpop.f32.mrb[49].mxu0  ;;  %v1510_v8 = vadd.f32 %v1509_v59, %v4594_v33 }
 0x2bf   : > { %v1513_v2 = vpop.f32.mrb[50].mxu0  ;;  %v1512_v7 = vadd.f32 %v1511_v60, %v4598_v21 }
 0x2c0   : > { %v1515_v58 = vpop.f32.mrb[51].mxu0  ;;  %v1514_v34 = vadd.f32 %v1513_v2, %v4594_v33 }
 0x2c1   : > { %v1516_v13 = vadd.f32 %v1515_v58, %v4598_v21 }
 0x2c6   : > { %v1622_v62 = vpop.f32.mrb[16].mxu1 }
 0x2c7   : > { %v1623_v41 = vadd.f32 %v1622_v62, %v1510_v8  ;;  %v1624_v25 = vpop.f32.mrb[17].mxu1 }
 0x2c8   : > { %v1625_v44 = vadd.f32 %v1624_v25, %v1512_v7  ;;  %v1626_v36 = vpop.f32.mrb[18].mxu1 }
 0x2c9   : > { %v2811_v10 = vmul.f32 -1.442695, %v1623_v41  ;;  %v1627_v3 = vadd.f32 %v1626_v36, %v1514_v34  ;;  %v1628_v19 = vpop.f32.mrb[19].mxu1 }
 0x2ca   : > { %v2812_v35 = vmul.f32 -1.442695, %v1625_v44  ;;  %v1629_v38 = vadd.f32 %v1628_v19, %v1516_v13 }
 0x2cb   : > { %3532 = vpow2.f32 %v2811_v10  ;;  %v2813_v27 = vmul.f32 -1.442695, %v1627_v3 }
 0x2cc   : > { %3534 = vpow2.f32 %v2812_v35  ;;  %v2814_v53 = vmul.f32 -1.442695, %v1629_v38 }
 0x2cd   : > { %3536 = vpow2.f32 %v2813_v27 }
 0x2ce   : > { %3538 = vpow2.f32 %v2814_v53  ;;  %v1632_v37 = vpop.f32.mrb[20].mxu1 }
 0x2cf   : > { %v1519_v28 = vpop.f32.mrb[52].mxu0  ;;  %v1634_v42 = vpop.f32.mrb[21].mxu1 }
 0x2d0   : > { %v1520_v43 = vadd.f32 %v1519_v28, %v4594_v33  ;;  %v1521_v24 = vpop.f32.mrb[53].mxu0  ;;  %v1636_v63 = vpop.f32.mrb[22].mxu1 }
 0x2d1   : > { %v1522_v48 = vadd.f32 %v1521_v24, %v4598_v21  ;;  %v1523_v29 = vpop.f32.mrb[54].mxu0  ;;  %v1638_v15 = vpop.f32.mrb[23].mxu1 }
 0x2d2   : > { %v1524_v6 = vadd.f32 %v1523_v29, %v4594_v33  ;;  %v1633_v23 = vadd.f32 %v1632_v37, %v1520_v43  ;;  %v1525_v14 = vpop.f32.mrb[55].mxu0 }
 0x2d3   : > { %v1526_v46 = vadd.f32 %v1525_v14, %v4598_v21  ;;  %v1635_v30 = vadd.f32 %v1634_v42, %v1522_v48 }
 0x2d4   : > { %v2815_v54 = vmul.f32 -1.442695, %v1633_v23  ;;  %v1637_v11 = vadd.f32 %v1636_v63, %v1524_v6 }
 0x2d5   : > { %v3533_v47 = vpop.eup %3532  ;;  %v2816_v49 = vmul.f32 -1.442695, %v1635_v30  ;;  %v1639_v16 = vadd.f32 %v1638_v15, %v1526_v46 }
 0x2d6   : > { %v3535_v50 = vpop.eup %3534  ;;  %v1773_v18 = vadd.f32 1.0, %v3533_v47  ;;  %3540 = vpow2.f32 %v2815_v54  ;;  %v2817_v40 = vmul.f32 -1.442695, %v1637_v11 }
 0x2d7   : > { %v3537_v61 = vpop.eup %3536  ;;  %v1774_v26 = vadd.f32 1.0, %v3535_v50  ;;  %3542 = vpow2.f32 %v2816_v49  ;;  %v1529_v55 = vpop.f32.mrb[56].mxu0  ;;  %v2818_v39 = vmul.f32 -1.442695, %v1639_v16 }
 0x2d8   : > { %v3539_v52 = vpop.eup %3538  ;;  %3544 = vrcp.f32 %v1773_v18  ;;  %v1775_v45 = vadd.f32 1.0, %v3537_v61  ;;  %v1530_v32 = vadd.f32 %v1529_v55, %v4594_v33  ;;  %v1531_v20 = vpop.f32.mrb[57].mxu0 }
 0x2d9   : > { %3546 = vrcp.f32 %v1774_v26  ;;  %v1776_v22 = vadd.f32 1.0, %v3539_v52  ;;  %v1532_v31 = vadd.f32 %v1531_v20, %v4598_v21  ;;  %v1533_v9 = vpop.f32.mrb[58].mxu0  ;;  %v1642_v0 = vpop.f32.mrb[24].mxu1 }
 0x2da   : > { %3548 = vrcp.f32 %v1775_v45  ;;  %v1534_v57 = vadd.f32 %v1533_v9, %v4594_v33  ;;  %v1643_v51 = vadd.f32 %v1642_v0, %v1530_v32  ;;  %v1535_v5 = vpop.f32.mrb[59].mxu0  ;;  %v1644_v12 = vpop.f32.mrb[25].mxu1 }
 0x2db   : > { %3550 = vrcp.f32 %v1776_v22  ;;  %v1536_v4 = vadd.f32 %v1535_v5, %v4598_v21  ;;  %v1645_v1 = vadd.f32 %v1644_v12, %v1532_v31  ;;  %v1646_v17 = vpop.f32.mrb[26].mxu1 }
 0x2dc   : > { %3552 = vpow2.f32 %v2817_v40  ;;  %v2819_v56 = vmul.f32 -1.442695, %v1643_v51  ;;  %v1647_v59 = vadd.f32 %v1646_v17, %v1534_v57  ;;  %v1648_v60 = vpop.f32.mrb[27].mxu1 }
 0x2dd   : > { %3554 = vpow2.f32 %v2818_v39  ;;  %v2820_v2 = vmul.f32 -1.442695, %v1645_v1  ;;  %v1649_v58 = vadd.f32 %v1648_v60, %v1536_v4 }
 0x2de   : > { %3556 = vpow2.f32 %v2819_v56  ;;  %v2821_v8 = vmul.f32 -1.442695, %v1647_v59 }
 0x2df   : > { %3558 = vpow2.f32 %v2820_v2  ;;  %v2822_v7 = vmul.f32 -1.442695, %v1649_v58 }
 0x2e0   : > { %v3541_v34 = vpop.eup %3540  ;;  %3560 = vpow2.f32 %v2821_v8 }
 0x2e1   : > { %v3543_v62 = vpop.eup %3542  ;;  %3562 = vpow2.f32 %v2822_v7  ;;  %v1652_v13 = vpop.f32.mrb[28].mxu1  ;;  %v1777_v36 = vadd.f32 1.0, %v3541_v34 }
 0x2e2   : > { %v4612_v41 = vpop.eup %3544  ;;  %v1654_v25 = vpop.f32.mrb[29].mxu1  ;;  %v1778_v19 = vadd.f32 1.0, %v3543_v62 }
 0x2e3   : > { %v4614_v44 = vpop.eup %3546  ;;  %v1656_v10 = vpop.f32.mrb[30].mxu1  ;;  %3564 = vrcp.f32 %v1777_v36 }
 0x2e4   : > { %v4616_v3 = vpop.eup %3548  ;;  %v1658_v35 = vpop.f32.mrb[31].mxu1  ;;  %3566 = vrcp.f32 %v1778_v19 }
 0x2e5   : > { %v4618_v38 = vpop.eup %3550  ;;  %v1861_v27 = vpack.c.bf16 %v4616_v3, %v4612_v41  ;;  %v3332_v41 = vld [vmem:[#allocation10] sm:$0xff]   ;;  %v3334_v3 = vld [vmem:[#allocation10 + $0x10] sm:$0xff]  }
 0x2e6   : > { %v3553_v53 = vpop.eup %3552  ;;  %v1862_v37 = vpack.c.bf16 %v4618_v38, %v4614_v44  ;;  %3004 = vmatprep.subr.bf16.mxu1 %v3332_v41  ;;  %v3333_v44 = vld [vmem:[#allocation10 + $0x8] sm:$0xff]   ;;  %v3335_v38 = vld [vmem:[#allocation10 + $0x18] sm:$0xff]  }
 0x2e7   : > { %v3555_v28 = vpop.eup %3554  ;;  %v1779_v42 = vadd.f32 1.0, %v3553_v53 }
 0x2e8   : > { %v3557_v43 = vpop.eup %3556  ;;  %v1780_v24 = vadd.f32 1.0, %v3555_v28  ;;  %v1539_v63 = vpop.f32.mrb[60].mxu0 }
 0x2e9   : > { %v3559_v48 = vpop.eup %3558  ;;  %3568 = vrcp.f32 %v1779_v42  ;;  %v1781_v29 = vadd.f32 1.0, %v3557_v43  ;;  %v1540_v15 = vadd.f32 %v1539_v63, %v4594_v33  ;;  %v1541_v6 = vpop.f32.mrb[61].mxu0 }
 0x2ea   : > { %v3561_v23 = vpop.eup %3560  ;;  %3570 = vrcp.f32 %v1780_v24  ;;  %v1782_v14 = vadd.f32 1.0, %v3559_v48  ;;  %v1542_v46 = vadd.f32 %v1541_v6, %v4598_v21  ;;  %v1543_v30 = vpop.f32.mrb[62].mxu0 }
 0x2eb   : > { %v3563_v54 = vpop.eup %3562  ;;  %3572 = vrcp.f32 %v1781_v29  ;;  %v1783_v11 = vadd.f32 1.0, %v3561_v23  ;;  %v1544_v47 = vadd.f32 %v1543_v30, %v4594_v33  ;;  %v1653_v49 = vadd.f32 %v1652_v13, %v1540_v15  ;;  %v1545_v16 = vpop.f32.mrb[63].mxu0 }
 0x2ec   : > { %3574 = vrcp.f32 %v1782_v14  ;;  %v1784_v50 = vadd.f32 1.0, %v3563_v54  ;;  %v1546_v18 = vadd.f32 %v1545_v16, %v4598_v21  ;;  %v1655_v61 = vadd.f32 %v1654_v25, %v1542_v46 }
 0x2ed   : > { %3576 = vrcp.f32 %v1783_v11  ;;  %v2823_v26 = vmul.f32 -1.442695, %v1653_v49  ;;  %v1657_v55 = vadd.f32 %v1656_v10, %v1544_v47  ;;  %v4628_v22 = vpop.eup %3564 }
 0x2ee   : > { %3578 = vrcp.f32 %v1784_v50  ;;  %v2824_v52 = vmul.f32 -1.442695, %v1655_v61  ;;  %v1659_v45 = vadd.f32 %v1658_v35, %v1546_v18  ;;  %v4631_v9 = vpop.eup %3566 }
 0x2ef   : > { %3580 = vpow2.f32 %v2823_v26  ;;  %v2825_v40 = vmul.f32 -1.442695, %v1657_v55 }
 0x2f0   : > { %3582 = vpow2.f32 %v2824_v52  ;;  %v2826_v32 = vmul.f32 -1.442695, %v1659_v45  ;;  %v1582_v20 = vpop.f32.mrb[32].mxu0 }
 0x2f1   : > { %3584 = vpow2.f32 %v2825_v40  ;;  %v3052_v39 = vadd.f32 %v1582_v20, %v4594_v33  ;;  %v1584_v31 = vpop.f32.mrb[33].mxu0 }
 0x2f2   : > { %3586 = vpow2.f32 %v2826_v32  ;;  %v3053_v0 = vadd.f32 %v1584_v31, %v4598_v21  ;;  %v1586_v57 = vpop.f32.mrb[34].mxu0 }
 0x2f3   : > { %v4634_v51 = vpop.eup %3568  ;;  %v2795_v5 = vmul.f32 -1.442695, %v3052_v39  ;;  %v3054_v12 = vadd.f32 %v1586_v57, %v4594_v33  ;;  %v1588_v4 = vpop.f32.mrb[35].mxu0 }
 0x2f4   : > { %v4637_v1 = vpop.eup %3570  ;;  %v2796_v17 = vmul.f32 -1.442695, %v3053_v0  ;;  %v3055_v56 = vadd.f32 %v1588_v4, %v4598_v21  ;;  %v1863_v59 = vpack.c.bf16 %v4634_v51, %v4628_v22  ;;  %v3338_v22 = vld [vmem:[#allocation10 + $0x30] sm:$0xff]  }
 0x2f5   : > { %v4642_v60 = vpop.eup %3572  ;;  %3588 = vpow2.f32 %v2795_v5  ;;  %v2797_v2 = vmul.f32 -1.442695, %v3054_v12  ;;  %v1864_v58 = vpack.c.bf16 %v4637_v1, %v4631_v9  ;;  %v3339_v9 = vld [vmem:[#allocation10 + $0x38] sm:$0xff]   ;;  %v4707_v1 = vld [vmem:[%s4909_s6] ss:$0 sm:$0xff] }
 0x2f6   : > { %v4646_v8 = vpop.eup %3574  ;;  %3590 = vpow2.f32 %v2796_v17  ;;  %v2798_v7 = vmul.f32 -1.442695, %v3055_v56 }
 0x2f7   : > { %v4648_v34 = vpop.eup %3576  ;;  %3592 = vpow2.f32 %v2797_v2 }
 0x2f8   : > { %v4650_v62 = vpop.eup %3578  ;;  %3594 = vpow2.f32 %v2798_v7  ;;  %v1592_v13 = vpop.f32.mrb[36].mxu0  ;;  %v1865_v25 = vpack.c.bf16 %v4648_v34, %v4642_v60 }
 0x2f9   : > { %v3581_v36 = vpop.eup %3580  ;;  %v3056_v10 = vadd.f32 %v1592_v13, %v4594_v33  ;;  %v1594_v19 = vpop.f32.mrb[37].mxu0  ;;  %v1866_v35 = vpack.c.bf16 %v4650_v62, %v4646_v8 }
 0x2fa   : > { %v3583_v53 = vpop.eup %3582  ;;  %v1785_v28 = vadd.f32 1.0, %v3581_v36  ;;  %v3057_v42 = vadd.f32 %v1594_v19, %v4598_v21  ;;  %v1596_v43 = vpop.f32.mrb[38].mxu0 }
 0x2fb   : > { %v3585_v24 = vpop.eup %3584  ;;  %v1786_v63 = vadd.f32 1.0, %v3583_v53  ;;  %v1598_v48 = vpop.f32.mrb[39].mxu0  ;;  %v2799_v6 = vmul.f32 -1.442695, %v3056_v10  ;;  %v3058_v46 = vadd.f32 %v1596_v43, %v4594_v33 }
 0x2fc   : > { %v3587_v29 = vpop.eup %3586  ;;  %3596 = vrcp.f32 %v1785_v28  ;;  %v1787_v15 = vadd.f32 1.0, %v3585_v24  ;;  %v2800_v14 = vmul.f32 -1.442695, %v3057_v42  ;;  %v3059_v54 = vadd.f32 %v1598_v48, %v4598_v21 }
 0x2fd   : > { %3598 = vrcp.f32 %v1786_v63  ;;  %v1788_v23 = vadd.f32 1.0, %v3587_v29  ;;  %v2801_v52 = vmul.f32 -1.442695, %v3058_v46 }
 0x2fe   : > { %3600 = vrcp.f32 %v1787_v15  ;;  %v2802_v20 = vmul.f32 -1.442695, %v3059_v54 }
 0x2ff   : > { %v3589_v30 = vpop.eup %3588  ;;  %3602 = vrcp.f32 %v1788_v23 }
 0x300   : > { %v3591_v11 = vpop.eup %3590  ;;  %v1757_v47 = vadd.f32 1.0, %v3589_v30  ;;  %3604 = vpow2.f32 %v2799_v6  ;;  %v1602_v49 = vpop.f32.mrb[40].mxu0 }
 0x301   : > { %v3593_v16 = vpop.eup %3592  ;;  %v1758_v50 = vadd.f32 1.0, %v3591_v11  ;;  %3606 = vpow2.f32 %v2800_v14  ;;  %v3060_v18 = vadd.f32 %v1602_v49, %v4594_v33  ;;  %v1604_v61 = vpop.f32.mrb[41].mxu0 }
 0x302   : > { %v3595_v26 = vpop.eup %3594  ;;  %3608 = vrcp.f32 %v1757_v47  ;;  %v1759_v55 = vadd.f32 1.0, %v3593_v16  ;;  %v3061_v45 = vadd.f32 %v1604_v61, %v4598_v21  ;;  %v1606_v40 = vpop.f32.mrb[42].mxu0 }
 0x303   : > { %3610 = vrcp.f32 %v1758_v50  ;;  %v1760_v32 = vadd.f32 1.0, %v3595_v26  ;;  %v3062_v39 = vadd.f32 %v1606_v40, %v4594_v33  ;;  %v1608_v31 = vpop.f32.mrb[43].mxu0  ;;  %v2803_v0 = vmul.f32 -1.442695, %v3060_v18 }
 0x304   : > { %3612 = vrcp.f32 %v1759_v55  ;;  %v3063_v57 = vadd.f32 %v1608_v31, %v4598_v21  ;;  %v2804_v5 = vmul.f32 -1.442695, %v3061_v45 }
 0x305   : > { %3614 = vrcp.f32 %v1760_v32  ;;  %v2805_v4 = vmul.f32 -1.442695, %v3062_v39 }
 0x306   : > { %v4664_v12 = vpop.eup %3596  ;;  %3616 = vpow2.f32 %v2801_v52  ;;  %v2806_v56 = vmul.f32 -1.442695, %v3063_v57 }
 0x307   : > { %v4666_v17 = vpop.eup %3598  ;;  %3618 = vpow2.f32 %v2802_v20 }
 0x308   : > { %v4668_v2 = vpop.eup %3600  ;;  %3620 = vpow2.f32 %v2803_v0  ;;  %v1612_v7 = vpop.f32.mrb[44].mxu0 }
 0x309   : > { %v4670_v13 = vpop.eup %3602  ;;  %3622 = vpow2.f32 %v2804_v5  ;;  %v3064_v36 = vadd.f32 %v1612_v7, %v4594_v33  ;;  %v1614_v10 = vpop.f32.mrb[45].mxu0  ;;  %v1867_v19 = vpack.c.bf16 %v4668_v2, %v4664_v12 }
 0x30a   : > { %v3605_v53 = vpop.eup %3604  ;;  %3624 = vpow2.f32 %v2805_v4  ;;  %v3065_v28 = vadd.f32 %v1614_v10, %v4598_v21  ;;  %v1616_v42 = vpop.f32.mrb[46].mxu0  ;;  %v1868_v43 = vpack.c.bf16 %v4670_v13, %v4666_v17 }
 0x30b   : > { %v3607_v24 = vpop.eup %3606  ;;  %v1761_v63 = vadd.f32 1.0, %v3605_v53  ;;  %3626 = vpow2.f32 %v2806_v56  ;;  %v2807_v48 = vmul.f32 -1.442695, %v3064_v36  ;;  %v3066_v29 = vadd.f32 %v1616_v42, %v4594_v33  ;;  %v1618_v15 = vpop.f32.mrb[47].mxu0 }
 0x30c   : > { %v3609_v6 = vpop.eup %3608  ;;  %v1762_v23 = vadd.f32 1.0, %v3607_v24  ;;  %v2808_v14 = vmul.f32 -1.442695, %v3065_v28  ;;  %v3067_v46 = vadd.f32 %v1618_v15, %v4598_v21 }
 0x30d   : > { %v3611_v30 = vpop.eup %3610  ;;  %3628 = vrcp.f32 %v1761_v63  ;;  %v2809_v54 = vmul.f32 -1.442695, %v3066_v29 }
 0x30e   : > { %v3613_v11 = vpop.eup %3612  ;;  %3630 = vrcp.f32 %v1762_v23  ;;  %v2810_v47 = vmul.f32 -1.442695, %v3067_v46 }
 0x30f   : > { %v3615_v49 = vpop.eup %3614  ;;  %3632 = vpow2.f32 %v2807_v48  ;;  %v1853_v16 = vpack.c.bf16 %v3613_v11, %v3609_v6 }
 0x310   : > { %v3617_v50 = vpop.eup %3616  ;;  %3634 = vpow2.f32 %v2808_v14  ;;  %v1854_v18 = vpack.c.bf16 %v3615_v49, %v3611_v30 }
 0x311   : > { %v3619_v61 = vpop.eup %3618  ;;  %v1763_v33 = vadd.f32 1.0, %v3617_v50  ;;  %3636 = vpow2.f32 %v2809_v54 }
 0x312   : > { %v3621_v26 = vpop.eup %3620  ;;  %v1764_v55 = vadd.f32 1.0, %v3619_v61  ;;  %3638 = vpow2.f32 %v2810_v47  ;;  %2036 = vmatprep.mubr.bf16.mxu1 %v1854_v18 }
 0x313   : > { %v3623_v21 = vpop.eup %3622  ;;  %3640 = vrcp.f32 %v1763_v33  ;;  %v1765_v52 = vadd.f32 1.0, %v3621_v26  ;;  %2037 = vmatmul.mubr.bf16.vlgmr.msra.gmra.mrb[32].mxu1 %v1853_v16 }
 0x314   : > { %v3625_v45 = vpop.eup %3624  ;;  %3642 = vrcp.f32 %v1764_v55  ;;  %v1766_v40 = vadd.f32 1.0, %v3623_v21  ;;  %3005 = vmatpush3.bf16.msra.mxu1 %v3332_v41 }
 0x315   : > { %v3627_v32 = vpop.eup %3626  ;;  %3644 = vrcp.f32 %v1765_v52  ;;  %v1767_v20 = vadd.f32 1.0, %v3625_v45  ;;  %3006 = vmatprep.subr.bf16.mxu1 %v3333_v44 }
 0x316   : > { %3646 = vrcp.f32 %v1766_v40  ;;  %v1768_v39 = vadd.f32 1.0, %v3627_v32 }
 0x317   : > { %v3629_v31 = vpop.eup %3628  ;;  %3648 = vrcp.f32 %v1767_v20 }
 0x318   : > { %v3631_v0 = vpop.eup %3630  ;;  %3650 = vrcp.f32 %v1768_v39  ;;  %3007 = vmatpush3.bf16.msra.mxu1 %v3333_v44 }
 0x319   : > { %v3633_v57 = vpop.eup %3632  ;;  %3008 = vmatprep.subr.bf16.mxu1 %v3334_v3 }
 0x31a   : > { %v3635_v5 = vpop.eup %3634  ;;  %v1769_v4 = vadd.f32 1.0, %v3633_v57 }
 0x31b   : > { %v3637_v56 = vpop.eup %3636  ;;  %v1770_v7 = vadd.f32 1.0, %v3635_v5 }
 0x31c   : > { %v3639_v36 = vpop.eup %3638  ;;  %3652 = vrcp.f32 %v1769_v4  ;;  %v1771_v10 = vadd.f32 1.0, %v3637_v56  ;;  %3009 = vmatpush3.bf16.msra.mxu1 %v3334_v3 }
 0x31d   : > { %v3641_v53 = vpop.eup %3640  ;;  %3654 = vrcp.f32 %v1770_v7  ;;  %v1772_v28 = vadd.f32 1.0, %v3639_v36  ;;  %3010 = vmatprep.subr.bf16.mxu1 %v3335_v38 }
 0x31e   : > { %v3643_v42 = vpop.eup %3642  ;;  %3656 = vrcp.f32 %v1771_v10  ;;  %v1855_v24 = vpack.c.bf16 %v3641_v53, %v3629_v31 }
 0x31f   : > { %v3645_v63 = vpop.eup %3644  ;;  %3658 = vrcp.f32 %v1772_v28  ;;  %v1856_v48 = vpack.c.bf16 %v3643_v42, %v3631_v0 }
 0x320   : > { %v3647_v29 = vpop.eup %3646  ;;  %3011 = vmatpush3.bf16.msra.mxu1 %v3335_v38 }
 0x321   : > { %v3649_v15 = vpop.eup %3648  ;;  %2044 = vmatprep.mubr.bf16.mxu1 %v1856_v48 }
 0x322   : > { %v3651_v6 = vpop.eup %3650  ;;  %2045 = vmatmul.mubr.bf16.gmra.mrb[36].mxu1 %v1855_v24  ;;  %v1857_v23 = vpack.c.bf16 %v3649_v15, %v3645_v63 }
 0x323   : > { %v1858_v14 = vpack.c.bf16 %v3651_v6, %v3647_v29 }
 0x325   : > { %2052 = vmatprep.mubr.bf16.mxu1 %v1858_v14 }
 0x326   : > { %v3653_v46 = vpop.eup %3652 }
 0x327   : > { %v3655_v30 = vpop.eup %3654 }
 0x328   : > { %v3657_v54 = vpop.eup %3656 }
 0x329   : > { %v3659_v11 = vpop.eup %3658  ;;  %v1859_v47 = vpack.c.bf16 %v3657_v54, %v3653_v46 }
 0x32a   : > { %2053 = vmatmul.mubr.bf16.gmra.mrb[40].mxu1 %v1857_v23  ;;  %v1860_v49 = vpack.c.bf16 %v3659_v11, %v3655_v30 }
 0x32c   : > { %2060 = vmatprep.mubr.bf16.mxu1 %v1860_v49 }
 0x332   : > { %2061 = vmatmul.mubr.bf16.gmra.mrb[44].mxu1 %v1859_v47 }
 0x333   : > { %2068 = vmatprep.mubr.bf16.mxu1 %v1862_v37  ;;  %v3337_v37 = vld [vmem:[#allocation10 + $0x28] sm:$0xff]  }
 0x33a   : > { %2069 = vmatmul.mubr.bf16.gmra.mrb[48].mxu1 %v1861_v27  ;;  %v3336_v27 = vld [vmem:[#allocation10 + $0x20] sm:$0xff]  }
 0x33b   : > { %2076 = vmatprep.mubr.bf16.mxu1 %v1864_v58  ;;  %3012 = vmatprep.subr.bf16.mxu1 %v3336_v27 }
 0x33c   : > { %3013 = vmatpush3.bf16.msra.mxu1 %v3336_v27 }
 0x33d   : > { %3014 = vmatprep.subr.bf16.mxu1 %v3337_v37 }
 0x340   : > { %3015 = vmatpush3.bf16.msra.mxu1 %v3337_v37 }
 0x341   : > { %3016 = vmatprep.subr.bf16.mxu1 %v3338_v22 }
 0x342   : > { %2077 = vmatmul.mubr.bf16.gmra.mrb[52].mxu1 %v1863_v59 }
 0x343   : > { %2084 = vmatprep.mubr.bf16.mxu1 %v1866_v35 }
 0x344   : > { %3017 = vmatpush3.bf16.msra.mxu1 %v3338_v22 }
 0x345   : > { %3018 = vmatprep.subr.bf16.mxu1 %v3339_v9 }
 0x348   : > { %3019 = vmatpush3.bf16.msra.mxu1 %v3339_v9 }
 0x34a   : > { %2085 = vmatmul.mubr.bf16.gmra.mrb[56].mxu1 %v1865_v25 }
 0x34b   : > { %2092 = vmatprep.mubr.bf16.mxu1 %v1868_v43 }
 0x352   : > { %2093 = vmatmul.mubr.bf16.gmra.mrb[60].mxu1 %v1867_v19 }
 0x3e6   : > { %v2908_v51 = vpop.f32.mrb[32].mxu1 }
 0x3e7   : > { %v2909_v59 = vpop.f32.mrb[33].mxu1 }
 0x3e8   : > { %v2910_v60 = vadd.f32 %v2909_v59, %v2908_v51  ;;  %v2911_v58 = vpop.f32.mrb[34].mxu1 }
 0x3e9   : > { %v2912_v8 = vpop.f32.mrb[35].mxu1 }
 0x3ea   : > { %v2039_v34 = vadd.f32 %v2910_v60, %v4707_v1  ;;  %v2913_v62 = vadd.f32 %v2912_v8, %v2911_v58 }
 0x3ec   : > { %v2844_v25 = vmul.f32 -1.442695, %v2039_v34  ;;  %v2042_v35 = vadd.f32 %v2913_v62, %v4707_v1 }
 0x3ee   : > { %3660 = vpow2.f32 %v2844_v25  ;;  %v2845_v12 = vmul.f32 -1.442695, %v2042_v35 }
 0x3f0   : > { %3662 = vpow2.f32 %v2845_v12 }
 0x3f5   : > { %v2914_v17 = vpop.f32.mrb[36].mxu1 }
 0x3f6   : > { %v2915_v2 = vpop.f32.mrb[37].mxu1 }
 0x3f7   : > { %v2916_v13 = vadd.f32 %v2915_v2, %v2914_v17  ;;  %v2917_v19 = vpop.f32.mrb[38].mxu1 }
 0x3f8   : > { %v3661_v43 = vpop.eup %3660  ;;  %v2918_v16 = vpop.f32.mrb[39].mxu1 }
 0x3f9   : > { %v2149_v50 = vadd.f32 1.0, %v3661_v43  ;;  %v2047_v18 = vadd.f32 %v2916_v13, %v4707_v1  ;;  %v2919_v61 = vadd.f32 %v2918_v16, %v2917_v19 }
 0x3fa   : > { %v3663_v33 = vpop.eup %3662 }
 0x3fb   : > { %v2150_v26 = vadd.f32 1.0, %v3663_v33  ;;  %v2846_v55 = vmul.f32 -1.442695, %v2047_v18  ;;  %v2050_v21 = vadd.f32 %v2919_v61, %v4707_v1  ;;  %3664 = vrcp.f32 %v2149_v50 }
 0x3fd   : > { %3666 = vrcp.f32 %v2150_v26  ;;  %v2847_v52 = vmul.f32 -1.442695, %v2050_v21  ;;  %v2920_v45 = vpop.f32.mrb[40].mxu1 }
 0x3fe   : > { %3668 = vpow2.f32 %v2846_v55  ;;  %v2921_v40 = vpop.f32.mrb[41].mxu1 }
 0x3ff   : > { %3670 = vpow2.f32 %v2847_v52  ;;  %v2922_v32 = vadd.f32 %v2921_v40, %v2920_v45  ;;  %v2923_v20 = vpop.f32.mrb[42].mxu1 }
 0x400   : > { %v2924_v39 = vpop.f32.mrb[43].mxu1 }
 0x401   : > { %v2055_v31 = vadd.f32 %v2922_v32, %v4707_v1  ;;  %v2925_v0 = vadd.f32 %v2924_v39, %v2923_v20 }
 0x403   : > { %v2848_v57 = vmul.f32 -1.442695, %v2055_v31  ;;  %v2058_v5 = vadd.f32 %v2925_v0, %v4707_v1 }
 0x405   : > { %3672 = vpow2.f32 %v2848_v57  ;;  %v2849_v4 = vmul.f32 -1.442695, %v2058_v5  ;;  %v2926_v56 = vpop.f32.mrb[44].mxu1  ;;  %v3665_v7 = vpop.eup %3664 }
 0x406   : > { %v2927_v36 = vpop.f32.mrb[45].mxu1 }
 0x407   : > { %v3667_v10 = vpop.eup %3666  ;;  %3674 = vpow2.f32 %v2849_v4  ;;  %v2928_v53 = vadd.f32 %v2927_v36, %v2926_v56  ;;  %v2929_v28 = vpop.f32.mrb[46].mxu1 }
 0x408   : > { %v3669_v42 = vpop.eup %3668  ;;  %v2930_v24 = vpop.f32.mrb[47].mxu1  ;;  %v2197_v63 = vpack.c.bf16 %v3667_v10, %v3665_v7 }
 0x409   : > { %v3671_v48 = vpop.eup %3670  ;;  %v2151_v29 = vadd.f32 1.0, %v3669_v42  ;;  %v2063_v15 = vadd.f32 %v2928_v53, %v4707_v1  ;;  %v2931_v6 = vadd.f32 %v2930_v24, %v2929_v28 }
 0x40a   : > { %v2152_v23 = vadd.f32 1.0, %v3671_v48  ;;  %3020 = vmatprep.mubr.bf16.mxu1 %v2197_v63 }
 0x40b   : > { %3676 = vrcp.f32 %v2151_v29  ;;  %v2850_v14 = vmul.f32 -1.442695, %v2063_v15  ;;  %v2066_v46 = vadd.f32 %v2931_v6, %v4707_v1 }
 0x40c   : > { %3678 = vrcp.f32 %v2152_v23 }
 0x40d   : > { %3680 = vpow2.f32 %v2850_v14  ;;  %v2851_v30 = vmul.f32 -1.442695, %v2066_v46  ;;  %v2932_v54 = vpop.f32.mrb[48].mxu1 }
 0x40e   : > { %v2933_v11 = vpop.f32.mrb[49].mxu1 }
 0x40f   : > { %v3673_v47 = vpop.eup %3672  ;;  %3682 = vpow2.f32 %v2851_v30  ;;  %v2934_v49 = vadd.f32 %v2933_v11, %v2932_v54  ;;  %v2935_v41 = vpop.f32.mrb[50].mxu1 }
 0x410   : > { %v2153_v44 = vadd.f32 1.0, %v3673_v47  ;;  %v2936_v3 = vpop.f32.mrb[51].mxu1 }
 0x411   : > { %v3675_v38 = vpop.eup %3674  ;;  %v2071_v27 = vadd.f32 %v2934_v49, %v4707_v1  ;;  %v2937_v37 = vadd.f32 %v2936_v3, %v2935_v41 }
 0x412   : > { %v2154_v22 = vadd.f32 1.0, %v3675_v38  ;;  %3684 = vrcp.f32 %v2153_v44 }
 0x413   : > { %v2852_v9 = vmul.f32 -1.442695, %v2071_v27  ;;  %v2074_v51 = vadd.f32 %v2937_v37, %v4707_v1 }
 0x414   : > { %3686 = vrcp.f32 %v2154_v22 }
 0x415   : > { %v3677_v59 = vpop.eup %3676  ;;  %3688 = vpow2.f32 %v2852_v9  ;;  %v2853_v60 = vmul.f32 -1.442695, %v2074_v51  ;;  %v2938_v58 = vpop.f32.mrb[52].mxu1 }
 0x416   : > { %v3679_v8 = vpop.eup %3678  ;;  %v2939_v34 = vpop.f32.mrb[53].mxu1 }
 0x417   : > { %v3681_v62 = vpop.eup %3680  ;;  %3690 = vpow2.f32 %v2853_v60  ;;  %v2940_v25 = vadd.f32 %v2939_v34, %v2938_v58  ;;  %v2941_v35 = vpop.f32.mrb[54].mxu1  ;;  %v2198_v12 = vpack.c.bf16 %v3679_v8, %v3677_v59 }
 0x418   : > { %v2155_v17 = vadd.f32 1.0, %v3681_v62  ;;  %v2942_v2 = vpop.f32.mrb[55].mxu1 }
 0x419   : > { %v3683_v13 = vpop.eup %3682  ;;  %v2079_v19 = vadd.f32 %v2940_v25, %v4707_v1  ;;  %v2943_v43 = vadd.f32 %v2942_v2, %v2941_v35  ;;  %3021 = vmatmul.mubr.bf16.vlgmr.msra.gmra.mrb[64].mxu1 %v2198_v12  ;;  %v2860_v12 = vld [vmem:[%s4911_s8] ss:$0 sm:$0xff] }
 0x41a   : > { %v2156_v16 = vadd.f32 1.0, %v3683_v13  ;;  %3692 = vrcp.f32 %v2155_v17 }
 0x41b   : > { %v2854_v50 = vmul.f32 -1.442695, %v2079_v19  ;;  %v2082_v18 = vadd.f32 %v2943_v43, %v4707_v1 }
 0x41c   : > { %3694 = vrcp.f32 %v2156_v16  ;;  %v3685_v61 = vpop.eup %3684 }
 0x41d   : > { %3696 = vpow2.f32 %v2854_v50  ;;  %v2855_v33 = vmul.f32 -1.442695, %v2082_v18  ;;  %v2944_v26 = vpop.f32.mrb[56].mxu1 }
 0x41e   : > { %v3687_v55 = vpop.eup %3686  ;;  %v2945_v21 = vpop.f32.mrb[57].mxu1 }
 0x41f   : > { %v3689_v52 = vpop.eup %3688  ;;  %3698 = vpow2.f32 %v2855_v33  ;;  %v2946_v45 = vadd.f32 %v2945_v21, %v2944_v26  ;;  %v2947_v40 = vpop.f32.mrb[58].mxu1  ;;  %v2199_v32 = vpack.c.bf16 %v3687_v55, %v3685_v61 }
 0x420   : > { %v2157_v20 = vadd.f32 1.0, %v3689_v52  ;;  %v2948_v39 = vpop.f32.mrb[59].mxu1 }
 0x421   : > { %v3691_v31 = vpop.eup %3690  ;;  %v2087_v0 = vadd.f32 %v2946_v45, %v4707_v1  ;;  %v2949_v57 = vadd.f32 %v2948_v39, %v2947_v40  ;;  %3024 = vmatprep.mubr.bf16.mxu1 %v2199_v32 }
 0x422   : > { %v2158_v5 = vadd.f32 1.0, %v3691_v31  ;;  %3700 = vrcp.f32 %v2157_v20 }
 0x423   : > { %v2856_v4 = vmul.f32 -1.442695, %v2087_v0  ;;  %v2090_v56 = vadd.f32 %v2949_v57, %v4707_v1 }
 0x424   : > { %3702 = vrcp.f32 %v2158_v5  ;;  %v3693_v7 = vpop.eup %3692 }
 0x425   : > { %3704 = vpow2.f32 %v2856_v4  ;;  %v2857_v36 = vmul.f32 -1.442695, %v2090_v56  ;;  %v2950_v10 = vpop.f32.mrb[60].mxu1 }
 0x426   : > { %v3695_v53 = vpop.eup %3694  ;;  %v2951_v28 = vpop.f32.mrb[61].mxu1 }
 0x427   : > { %v3697_v42 = vpop.eup %3696  ;;  %3706 = vpow2.f32 %v2857_v36  ;;  %v2952_v24 = vadd.f32 %v2951_v28, %v2950_v10  ;;  %v2953_v63 = vpop.f32.mrb[62].mxu1  ;;  %v2200_v48 = vpack.c.bf16 %v3695_v53, %v3693_v7 }
 0x428   : > { %v2159_v29 = vadd.f32 1.0, %v3697_v42  ;;  %v2954_v15 = vpop.f32.mrb[63].mxu1 }
 0x429   : > { %v3699_v6 = vpop.eup %3698  ;;  %v2095_v23 = vadd.f32 %v2952_v24, %v4707_v1  ;;  %v2955_v14 = vadd.f32 %v2954_v15, %v2953_v63  ;;  %3025 = vmatmul.mubr.bf16.gmra.mrb[68].mxu1 %v2200_v48 }
 0x42a   : > { %v2160_v46 = vadd.f32 1.0, %v3699_v6  ;;  %3708 = vrcp.f32 %v2159_v29 }
 0x42b   : > { %v2858_v30 = vmul.f32 -1.442695, %v2095_v23  ;;  %v2098_v54 = vadd.f32 %v2955_v14, %v4707_v1 }
 0x42c   : > { %3710 = vrcp.f32 %v2160_v46  ;;  %v3701_v11 = vpop.eup %3700 }
 0x42d   : > { %3712 = vpow2.f32 %v2858_v30  ;;  %v2859_v47 = vmul.f32 -1.442695, %v2098_v54 }
 0x42e   : > { %v3703_v49 = vpop.eup %3702 }
 0x42f   : > { %v3705_v41 = vpop.eup %3704  ;;  %3714 = vpow2.f32 %v2859_v47  ;;  %v2201_v44 = vpack.c.bf16 %v3703_v49, %v3701_v11 }
 0x430   : > { %v2161_v3 = vadd.f32 1.0, %v3705_v41 }
 0x431   : > { %v3707_v38 = vpop.eup %3706  ;;  %3028 = vmatprep.mubr.bf16.mxu1 %v2201_v44 }
 0x432   : > { %v2162_v27 = vadd.f32 1.0, %v3707_v38  ;;  %3716 = vrcp.f32 %v2161_v3 }
 0x434   : > { %3718 = vrcp.f32 %v2162_v27  ;;  %v3709_v37 = vpop.eup %3708 }
 0x436   : > { %v3711_v22 = vpop.eup %3710 }
 0x437   : > { %v3713_v9 = vpop.eup %3712  ;;  %v2202_v51 = vpack.c.bf16 %v3711_v22, %v3709_v37 }
 0x438   : > { %v2163_v59 = vadd.f32 1.0, %v3713_v9 }
 0x439   : > { %v3715_v1 = vpop.eup %3714  ;;  %3029 = vmatmul.mubr.bf16.gmra.mrb[72].mxu1 %v2202_v51 }
 0x43a   : > { %v2164_v60 = vadd.f32 1.0, %v3715_v1  ;;  %3720 = vrcp.f32 %v2163_v59 }
 0x43c   : > { %3722 = vrcp.f32 %v2164_v60  ;;  %v3717_v58 = vpop.eup %3716 }
 0x43e   : > { %v3719_v8 = vpop.eup %3718 }
 0x43f   : > { %v2203_v34 = vpack.c.bf16 %v3719_v8, %v3717_v58 }
 0x441   : > { %3032 = vmatprep.mubr.bf16.mxu1 %v2203_v34 }
 0x444   : > { %v3721_v62 = vpop.eup %3720 }
 0x446   : > { %v3723_v25 = vpop.eup %3722 }
 0x447   : > { %v2204_v35 = vpack.c.bf16 %v3723_v25, %v3721_v62 }
 0x449   : > { %3033 = vmatmul.mubr.bf16.gmra.mrb[76].mxu1 %v2204_v35 }
 0x4ec   : > { %v3022_v17 = vpop.f32.mrb[64].mxu1 }
 0x4ed   : > { %v2319_v2 = vadd.f32 %v3022_v17, %v2860_v12  ;;  %v2310_v13 = vpop.f32.mrb[65].mxu1 }
 0x4ee   : > { %v2311_v19 = vadd.f32 %v2860_v12, %v2310_v13  ;;  %v3023_v43 = vpop.f32.mrb[66].mxu1 }
 0x4ef   : > { %2377 = vmax.xlane.f32.xlu1 %v2319_v2  ;;  %v2313_v16 = vpop.f32.mrb[67].mxu1  ;;  %v2322_v50 = vadd.f32 %v3023_v43, %v2860_v12 }
 0x4f0   : > { %2373 = vmax.xlane.f32.xlu0 %v2311_v19  ;;  %v2314_v18 = vadd.f32 %v2860_v12, %v2313_v16 }
 0x4f3   : > { %2379 = vmax.xlane.f32.xlu1 %v2322_v50 }
 0x4f4   : > { %2375 = vmax.xlane.f32.xlu0 %v2314_v18 }
 0x4fc   : > { %v3026_v61 = vpop.f32.mrb[68].mxu1 }
 0x4fd   : > { %v2335_v33 = vadd.f32 %v3026_v61, %v2860_v12  ;;  %v2326_v26 = vpop.f32.mrb[69].mxu1 }
 0x4fe   : > { %v3027_v55 = vpop.f32.mrb[70].mxu1  ;;  %v4728_v45 = vadd.f32 %v2860_v12, %v2326_v26 }
 0x4ff   : > { %v2338_v21 = vadd.f32 %v3027_v55, %v2860_v12  ;;  %v2329_v52 = vpop.f32.mrb[71].mxu1  ;;  %2385 = vmax.xlane.f32.xlu0 %v2335_v33 }
 0x500   : > { %v4730_v40 = vadd.f32 %v2860_v12, %v2329_v52 }
 0x501   : > { %2387 = vmax.xlane.f32.xlu1 %v2338_v21 }
 0x503   : > { %2381 = vmax.xlane.f32.xlu0 %v4728_v45 }
 0x505   : > { %2383 = vmax.xlane.f32.xlu1 %v4730_v40 }
 0x50c   : > { %v3030_v32 = vpop.f32.mrb[72].mxu1 }
 0x50d   : > { %v4734_v20 = vadd.f32 %v3030_v32, %v2860_v12  ;;  %v2342_v39 = vpop.f32.mrb[73].mxu1 }
 0x50e   : > { %v3031_v31 = vpop.f32.mrb[74].mxu1  ;;  %v4739_v5 = vadd.f32 %v2860_v12, %v2342_v39 }
 0x50f   : > { %v4736_v0 = vadd.f32 %v3031_v31, %v2860_v12  ;;  %2393 = vmax.xlane.f32.xlu0 %v4734_v20  ;;  %v2345_v57 = vpop.f32.mrb[75].mxu1 }
 0x510   : > { %v4742_v4 = vadd.f32 %v2860_v12, %v2345_v57 }
 0x511   : > { %2395 = vmax.xlane.f32.xlu1 %v4736_v0 }
 0x513   : > { %2389 = vmax.xlane.f32.xlu0 %v4739_v5 }
 0x515   : > { %2391 = vmax.xlane.f32.xlu1 %v4742_v4 }
 0x51c   : > { %v3034_v56 = vpop.f32.mrb[76].mxu1 }
 0x51d   : > { %v2358_v7 = vpop.f32.mrb[77].mxu1  ;;  %v4751_v42 = vadd.f32 %v3034_v56, %v2860_v12 }
 0x51e   : > { %v4746_v36 = vadd.f32 %v2860_v12, %v2358_v7  ;;  %v3035_v10 = vpop.f32.mrb[78].mxu1 }
 0x51f   : > { %v2361_v53 = vpop.f32.mrb[79].mxu1  ;;  %v4754_v24 = vadd.f32 %v3035_v10, %v2860_v12 }
 0x520   : > { %v4748_v28 = vadd.f32 %v2860_v12, %v2361_v53  ;;  %2397 = vmax.xlane.f32.xlu0 %v4746_v36 }
 0x522   : > { %2399 = vmax.xlane.f32.xlu1 %v4748_v28 }
 0x524   : > { %2401 = vmax.xlane.f32.xlu0 %v4751_v42 }
 0x526   : > { %2403 = vmax.xlane.f32.xlu1 %v4754_v24 }
 0x57c   : > { %v2378_v63 = vpop.xlane.xlu1 %2377 }
 0x57d   : > { %v2407_v48 = vsub.f32 %v2319_v2, %v2378_v63  ;;  %v2374_v29 = vpop.xlane.xlu0 %2373 }
 0x57e   : > { %v2405_v15 = vsub.f32 %v2311_v19, %v2374_v29 }
 0x57f   : > { %v2425_v6 = vmul.f32 1.442695, %v2407_v48 }
 0x580   : > { %v2421_v23 = vmul.f32 1.442695, %v2405_v15  ;;  %v2380_v14 = vpop.xlane.xlu1 %2379 }
 0x581   : > { %3724 = vpow2.f32 %v2425_v6  ;;  %v2408_v46 = vsub.f32 %v2322_v50, %v2380_v14  ;;  %v2376_v30 = vpop.xlane.xlu0 %2375 }
 0x582   : > { %v2406_v54 = vsub.f32 %v2314_v18, %v2376_v30  ;;  %3726 = vpow2.f32 %v2421_v23 }
 0x583   : > { %v2427_v11 = vmul.f32 1.442695, %v2408_v46 }
 0x584   : > { %v2423_v47 = vmul.f32 1.442695, %v2406_v54 }
 0x585   : > { %3728 = vpow2.f32 %v2427_v11 }
 0x586   : > { %3730 = vpow2.f32 %v2423_v47 }
 0x58b   : > { %v4758_v49 = vpop.eup %3724 }
 0x58c   : > { %v2386_v41 = vpop.xlane.xlu0 %2385  ;;  %2457 = vadd.xlane.f32.xlu0 %v4758_v49  ;;  %v4761_v3 = vpop.eup %3726 }
 0x58d   : > { %v2411_v44 = vsub.f32 %v2335_v33, %v2386_v41 }
 0x58e   : > { %v2388_v38 = vpop.xlane.xlu1 %2387 }
 0x58f   : > { %v4763_v27 = vpop.eup %3728  ;;  %v2433_v37 = vmul.f32 1.442695, %v2411_v44  ;;  %v2412_v22 = vsub.f32 %v2338_v21, %v2388_v38 }
 0x590   : > { %v2382_v9 = vpop.xlane.xlu0 %2381  ;;  %2459 = vadd.xlane.f32.xlu1 %v4763_v27  ;;  %2453 = vadd.xlane.f32.xlu0 %v4761_v3  ;;  %v4768_v60 = vpop.eup %3730 }
 0x591   : > { %3732 = vpow2.f32 %v2433_v37  ;;  %v2435_v51 = vmul.f32 1.442695, %v2412_v22  ;;  %v2409_v59 = vsub.f32 %v4728_v45, %v2382_v9 }
 0x592   : > { %v2384_v1 = vpop.xlane.xlu1 %2383 }
 0x593   : > { %3734 = vpow2.f32 %v2435_v51  ;;  %v2429_v58 = vmul.f32 1.442695, %v2409_v59  ;;  %v2410_v8 = vsub.f32 %v4730_v40, %v2384_v1 }
 0x594   : > { %2455 = vadd.xlane.f32.xlu1 %v4768_v60 }
 0x595   : > { %3736 = vpow2.f32 %v2429_v58  ;;  %v2431_v34 = vmul.f32 1.442695, %v2410_v8 }
 0x597   : > { %3738 = vpow2.f32 %v2431_v34 }
 0x59b   : > { %v4772_v62 = vpop.eup %3732 }
 0x59c   : > { %v2394_v25 = vpop.xlane.xlu0 %2393  ;;  %2465 = vadd.xlane.f32.xlu0 %v4772_v62 }
 0x59d   : > { %v4775_v35 = vpop.eup %3734  ;;  %v2415_v12 = vsub.f32 %v4734_v20, %v2394_v25 }
 0x59e   : > { %v2396_v17 = vpop.xlane.xlu1 %2395  ;;  %2467 = vadd.xlane.f32.xlu1 %v4775_v35 }
 0x59f   : > { %v4779_v2 = vpop.eup %3736  ;;  %v2441_v13 = vmul.f32 1.442695, %v2415_v12  ;;  %v2416_v19 = vsub.f32 %v4736_v0, %v2396_v17 }
 0x5a0   : > { %2461 = vadd.xlane.f32.xlu0 %v4779_v2  ;;  %v2390_v43 = vpop.xlane.xlu0 %2389 }
 0x5a1   : > { %v4783_v16 = vpop.eup %3738  ;;  %3740 = vpow2.f32 %v2441_v13  ;;  %v2443_v50 = vmul.f32 1.442695, %v2416_v19  ;;  %v2413_v18 = vsub.f32 %v4739_v5, %v2390_v43 }
 0x5a2   : > { %2463 = vadd.xlane.f32.xlu1 %v4783_v16  ;;  %v2392_v61 = vpop.xlane.xlu1 %2391 }
 0x5a3   : > { %3742 = vpow2.f32 %v2443_v50  ;;  %v2437_v33 = vmul.f32 1.442695, %v2413_v18  ;;  %v2414_v26 = vsub.f32 %v4742_v4, %v2392_v61 }
 0x5a5   : > { %3744 = vpow2.f32 %v2437_v33  ;;  %v2439_v55 = vmul.f32 1.442695, %v2414_v26 }
 0x5a7   : > { %3746 = vpow2.f32 %v2439_v55 }
 0x5ab   : > { %v4788_v21 = vpop.eup %3740 }
 0x5ac   : > { %2473 = vadd.xlane.f32.xlu0 %v4788_v21 }
 0x5ad   : > { %v4791_v52 = vpop.eup %3742  ;;  %v2398_v45 = vpop.xlane.xlu0 %2397 }
 0x5ae   : > { %v2417_v40 = vsub.f32 %v4746_v36, %v2398_v45  ;;  %2475 = vadd.xlane.f32.xlu1 %v4791_v52 }
 0x5af   : > { %v4795_v32 = vpop.eup %3744  ;;  %v2400_v20 = vpop.xlane.xlu1 %2399 }
 0x5b0   : > { %v2445_v39 = vmul.f32 1.442695, %v2417_v40  ;;  %v2418_v31 = vsub.f32 %v4748_v28, %v2400_v20  ;;  %2469 = vadd.xlane.f32.xlu0 %v4795_v32 }
 0x5b1   : > { %v4799_v0 = vpop.eup %3746  ;;  %v2402_v57 = vpop.xlane.xlu0 %2401 }
 0x5b2   : > { %3748 = vpow2.f32 %v2445_v39  ;;  %v2447_v5 = vmul.f32 1.442695, %v2418_v31  ;;  %v2419_v4 = vsub.f32 %v4751_v42, %v2402_v57  ;;  %2471 = vadd.xlane.f32.xlu1 %v4799_v0 }
 0x5b3   : > { %v2404_v56 = vpop.xlane.xlu1 %2403 }
 0x5b4   : > { %3750 = vpow2.f32 %v2447_v5  ;;  %v2449_v7 = vmul.f32 1.442695, %v2419_v4  ;;  %v2420_v36 = vsub.f32 %v4754_v24, %v2404_v56 }
 0x5b6   : > { %3752 = vpow2.f32 %v2449_v7  ;;  %v2451_v10 = vmul.f32 1.442695, %v2420_v36 }
 0x5b8   : > { %3754 = vpow2.f32 %v2451_v10 }
 0x5bc   : > { %v4804_v53 = vpop.eup %3748 }
 0x5bd   : > { %2477 = vadd.xlane.f32.xlu0 %v4804_v53 }
 0x5be   : > { %v4807_v28 = vpop.eup %3750 }
 0x5bf   : > { %2479 = vadd.xlane.f32.xlu1 %v4807_v28 }
 0x5c0   : > { %v4810_v42 = vpop.eup %3752 }
 0x5c1   : > { %2481 = vadd.xlane.f32.xlu0 %v4810_v42 }
 0x5c2   : > { %v4813_v63 = vpop.eup %3754 }
 0x5c3   : > { %2483 = vadd.xlane.f32.xlu1 %v4813_v63 }
 0x619   : > { %v2458_v24 = vpop.xlane.xlu0 %2457 }
 0x61a   : > { %3756 = vrcp.f32 %v2458_v24 }
 0x61d   : > { %v2460_v48 = vpop.xlane.xlu1 %2459  ;;  %v2454_v29 = vpop.xlane.xlu0 %2453 }
 0x61e   : > { %3758 = vrcp.f32 %v2460_v48 }
 0x61f   : > { %3760 = vrcp.f32 %v2454_v29 }
 0x621   : > { %v2456_v15 = vpop.xlane.xlu1 %2455 }
 0x622   : > { %3762 = vrcp.f32 %v2456_v15 }
 0x624   : > { %v3757_v6 = vpop.eup %3756 }
 0x625   : > { %v2503_v23 = vmul.f32 %v3757_v6, %v4758_v49 }
 0x627   : > { %2519 = vst [vmem:[%s4819_s19 + $0x10] sm:$0xff] %v2503_v23 }
 0x628   : > { %v3759_v14 = vpop.eup %3758 }
 0x629   : > { %v3761_v46 = vpop.eup %3760  ;;  %v2504_v30 = vmul.f32 %v3759_v14, %v4763_v27  ;;  %v2466_v54 = vpop.xlane.xlu0 %2465 }
 0x62a   : > { %v2501_v11 = vmul.f32 %v3761_v46, %v4761_v3  ;;  %3764 = vrcp.f32 %v2466_v54 }
 0x62b   : > { %2520 = vst [vmem:[%s4819_s19 + $0x18] sm:$0xff] %v2504_v30  ;;  %v2468_v47 = vpop.xlane.xlu1 %2467 }
 0x62c   : > { %v3763_v49 = vpop.eup %3762  ;;  %2517 = vst [vmem:[%s4819_s19] sm:$0xff] %v2501_v11  ;;  %3766 = vrcp.f32 %v2468_v47 }
 0x62d   : > { %v2502_v41 = vmul.f32 %v3763_v49, %v4768_v60  ;;  %v2462_v44 = vpop.xlane.xlu0 %2461 }
 0x62e   : > { %3768 = vrcp.f32 %v2462_v44 }
 0x62f   : > { %2518 = vst [vmem:[%s4819_s19 + $0x8] sm:$0xff] %v2502_v41  ;;  %v2464_v38 = vpop.xlane.xlu1 %2463 }
 0x630   : > { %3770 = vrcp.f32 %v2464_v38 }
 0x634   : > { %v3765_v27 = vpop.eup %3764 }
 0x635   : > { %v2507_v3 = vmul.f32 %v3765_v27, %v4772_v62 }
 0x636   : > { %v3767_v37 = vpop.eup %3766 }
 0x637   : > { %2523 = vst [vmem:[%s4819_s19 + $0x30] sm:$0xff] %v2507_v3  ;;  %v2508_v22 = vmul.f32 %v3767_v37, %v4775_v35 }
 0x638   : > { %v3769_v9 = vpop.eup %3768 }
 0x639   : > { %2524 = vst [vmem:[%s4819_s19 + $0x38] sm:$0xff] %v2508_v22  ;;  %v2505_v51 = vmul.f32 %v3769_v9, %v4779_v2  ;;  %v2474_v59 = vpop.xlane.xlu0 %2473 }
 0x63a   : > { %v3771_v1 = vpop.eup %3770  ;;  %3772 = vrcp.f32 %v2474_v59 }
 0x63b   : > { %2521 = vst [vmem:[%s4819_s19 + $0x20] sm:$0xff] %v2505_v51  ;;  %v2506_v60 = vmul.f32 %v3771_v1, %v4783_v16  ;;  %v2476_v58 = vpop.xlane.xlu1 %2475 }
 0x63c   : > { %3774 = vrcp.f32 %v2476_v58 }
 0x63d   : > { %2522 = vst [vmem:[%s4819_s19 + $0x28] sm:$0xff] %v2506_v60  ;;  %v2470_v8 = vpop.xlane.xlu0 %2469 }
 0x63e   : > { %3776 = vrcp.f32 %v2470_v8 }
 0x63f   : > { %v2472_v34 = vpop.xlane.xlu1 %2471 }
 0x640   : > { %3778 = vrcp.f32 %v2472_v34 }
 0x644   : > { %v3773_v62 = vpop.eup %3772 }
 0x645   : > { %v2511_v25 = vmul.f32 %v3773_v62, %v4788_v21 }
 0x646   : > { %v3775_v35 = vpop.eup %3774 }
 0x647   : > { %2527 = vst [vmem:[%s4819_s19 + $0x50] sm:$0xff] %v2511_v25  ;;  %v2512_v12 = vmul.f32 %v3775_v35, %v4791_v52 }
 0x648   : > { %v3777_v17 = vpop.eup %3776 }
 0x649   : > { %2528 = vst [vmem:[%s4819_s19 + $0x58] sm:$0xff] %v2512_v12  ;;  %v2509_v2 = vmul.f32 %v3777_v17, %v4795_v32 }
 0x64a   : > { %v3779_v13 = vpop.eup %3778  ;;  %v2478_v19 = vpop.xlane.xlu0 %2477 }
 0x64b   : > { %2525 = vst [vmem:[%s4819_s19 + $0x40] sm:$0xff] %v2509_v2  ;;  %v2510_v43 = vmul.f32 %v3779_v13, %v4799_v0  ;;  %3780 = vrcp.f32 %v2478_v19 }
 0x64c   : > { %v2480_v16 = vpop.xlane.xlu1 %2479 }
 0x64d   : > { %2526 = vst [vmem:[%s4819_s19 + $0x48] sm:$0xff] %v2510_v43  ;;  %3782 = vrcp.f32 %v2480_v16 }
 0x64e   : > { %v2482_v50 = vpop.xlane.xlu0 %2481 }
 0x64f   : > { %3784 = vrcp.f32 %v2482_v50 }
 0x650   : > { %v2484_v18 = vpop.xlane.xlu1 %2483 }
 0x651   : > { %3786 = vrcp.f32 %v2484_v18 }
 0x655   : > { %v3781_v61 = vpop.eup %3780 }
 0x656   : > { %v2513_v33 = vmul.f32 %v3781_v61, %v4804_v53 }
 0x657   : > { %v3783_v26 = vpop.eup %3782 }
 0x658   : > { %2529 = vst [vmem:[%s4819_s19 + $0x60] sm:$0xff] %v2513_v33  ;;  %v2514_v55 = vmul.f32 %v3783_v26, %v4807_v28 }
 0x659   : > { %v3785_v21 = vpop.eup %3784 }
 0x65a   : > { %2530 = vst [vmem:[%s4819_s19 + $0x68] sm:$0xff] %v2514_v55  ;;  %v2515_v52 = vmul.f32 %v3785_v21, %v4810_v42 }
 0x65b   : > { %v3787_v45 = vpop.eup %3786 }
 0x65c   : > { %2531 = vst [vmem:[%s4819_s19 + $0x70] sm:$0xff] %v2515_v52  ;;  %v2516_v40 = vmul.f32 %v3787_v45, %v4813_v63 }
 0x65e   : > { %2532 = vst [vmem:[%s4819_s19 + $0x78] sm:$0xff] %v2516_v40 }
 0x65f   : > { %3943 = shalt.err (!%p3940_p13)
}
 0x660   : > { %s3944_s1 = scalar_lea.hbm %s4854_s30, 2048  ;;  %s3948_s18 = scalar_lea.hbm %s4912_s9, 4096 }
 0x661   : > { %p3945_p9 = scmp.ne.s32.totalorder %s4854_s30, %s3944_s1  ;;  %p3949_p4 = scmp.lt.u32.totalorder %s4854_s30, %s4912_s9 }
 0x662   : > { %p3950_p8 = scmp.lt.u32.totalorder %s3948_s18, %s3944_s1  ;;  %p3952_p3 = scmp.lt.u32.totalorder %s3944_s1, %s4854_s30 }
 0x663   : > { %p3946_p0 = pnand %p3945_p9, %p4236_p10 }
 0x664   : > { %p3951_p6 = por %p3950_p8, %p3949_p4 }
 0x665   : > { %p3947_p11 = pneg %p3946_p0 }
 0x666   : > { %p3953_p5 = por %p3952_p3, %p3951_p6 }
 0x668   : > { %p3954_p7 = pnand %p3953_p5, %p3947_p11 }
 0x66a   : > { %3957 = shalt.err (!%p3954_p7)
}
 0x66b   : > { %s4019_s22 = smov 128   ;;  %s4020_s24 = smov 8  }
 0x66c   : > { %3134 = dma.vmem_to_hbm [thread:$0]  (%p4236_p10), %s4856_s25, 2048, %s4854_s30, %s2534_s13, %s4019_s22, %s4019_s22, %s4020_s24  }
 0x66d PF: > { %s4940_s15 = sld [smem:[#allocation16_spill]]  ;;  %s4941_s17 = sld [smem:[#allocation17_spill]] }
 0x66e   : > { %p4943_p2 = scmp.ge.s32.totalorder %s4004_s12, 2 }
 0x673   : > { %s2562_s21 = sand.u32 1, %s4940_s15   ;;  %p4942_p12 = scmp.ne.s32.totalorder %s4941_s17, 0 }
 0x674   : > { %s2563_s23 = scalar_lea.sflag [#allocation4], %s2562_s21 }
 0x675   : > { %p3154_p1 = pnand %p4943_p2, %p4942_p12 }
 0x677   : > { %3987 = dma.done.wait (!%p3154_p1), %s2563_s23, 2048  }
 0x678   : > { %3989 = vsyncadd (!%p3154_p1), %s2563_s23, 4294965248  ;;  %p24_p13 = scmp.ge.s32.totalorder %s4226_s28, 4   ;;  %s4944_s30 = smov %s3996_s10 }
 0x679   : > { %s4945_s10 = smov %s4000_s11  ;;  %s4946_s11 = smov %s4242_s14 }
 0x67a   : > { %s4947_s12 = smov %s4226_s28  ;;  %26 = sbr.rel (!%p24_p13) target bundleno = 9 (0x9), region = 117 }
 0x681   :  { %2568 = vsyncpa [#allocation3], 1 }
 0x682   :  { %2570 = vsyncpa [#allocation3 + $0x1], 1 }
 0x683   :  { %2571 = vsyncpa [#allocation6], 1 }
 0x684   :  { %2572 = vsyncpa [#allocation9], 1 }
 0x685   :  { %2573 = vsyncpa [#allocation4], 1 }
 0x686   :  { %2575 = vsyncpa [#allocation4 + $0x1], 1 }

</bundles_post_ra>
